<compile_context>
chip_gen: v7x
topology: tpu7x:2x2x1
jax: 0.10.0
libtpu: 0.0.40
codegen_flags: <defaults>
</compile_context>

<pallas_src>
import numpy as np
import jax
import jax.numpy as jnp
from jax import random
from jax.experimental import pallas as pl
from jax.experimental.pallas import tpu as pltpu


# --------------------------------------------------------------- constants

def make_conv_selector(batch, h, w, out_order="bp"):
    """0/1 gather matrix for a 3x3 / stride 2 / pad 1 conv on (batch, h, w, C)
    activations stored as a (batch*h*w, C) row-major matrix.

    Returns S of shape (9 * batch*ho*wo, batch*h*w); row t*(batch*ho*wo) + r
    selects the input row feeding output slot r for tap t (zero row for padding
    taps), so S @ A yields the tap-stacked im2col patches.

    out_order: "bp" -> r = b*npos + p  (batch-major output rows)
               "pb" -> r = p*batch + b (position-major output rows)"""
    ho, wo = h // 2, w // 2
    npos = ho * wo
    s = np.zeros((9 * batch * npos, batch * h * w), np.float32)
    for t in range(9):
        kh, kw = divmod(t, 3)
        for b in range(batch):
            for oh in range(ho):
                for ow in range(wo):
                    ih, iw = 2 * oh + kh - 1, 2 * ow + kw - 1
                    if 0 <= ih < h and 0 <= iw < w:
                        p = oh * wo + ow
                        r = b * npos + p if out_order == "bp" else p * batch + b
                        s[t * batch * npos + r, b * h * w + ih * w + iw] = 1.0
    return jnp.asarray(s)


def conv1_im2col(x_nhwc):
    """(B, 16, 16, C) -> (B*64, 9*C) patches for a 3x3 / stride 2 / pad 1 conv.
    Column order = (kh, kw, cin); row order = (b, oh, ow)."""
    b, h, w, c = x_nhwc.shape
    ho, wo = h // 2, w // 2
    xp = jnp.pad(x_nhwc, ((0, 0), (1, 1), (1, 1), (0, 0)))
    cols = []
    for kh in range(3):
        for kw in range(3):
            cols.append(xp[:, kh:kh + 2 * ho:2, kw:kw + 2 * wo:2, :])
    xcol = jnp.stack(cols, axis=3)                  # (B, Ho, Wo, 9, C)
    return xcol.reshape(b * ho * wo, 9 * c)


# ------------------------------------------------------------ fused kernel

def a3c_fused_kernel(xcol_ref, hx_ref, w1_ref, s2_ref, w23_ref, s3_ref,
                     wbig_ref, bias_ref, value_ref, logp_ref, hxo_ref):
    mm = lambda a, b: jnp.dot(a, b, preferred_element_type=jnp.float32)

    bias = bias_ref[...]                            # (8, 128) bias slab
    w2 = w23_ref[0]                                 # (9, 32, 32)
    w3 = w23_ref[1]                                 # (9, 32, 32)
    co = w1_ref.shape[1]                            # conv out channels (32)

    # ---- conv1: patches pre-gathered in the wrapper -> one GEMM + ReLU ----
    a1 = jnp.maximum(mm(xcol_ref[...], w1_ref[...]) + bias[3:4, 0:co], 0.0)  # (B*64, 32)

    # ---- conv2: in-VMEM im2col via 0/1 gather GEMM, then 9 tap GEMMs ----
    p2 = mm(s2_ref[...], a1)                        # (9*B*16, 32), rows (b, oh, ow)
    n2 = p2.shape[0] // 9
    acc2 = mm(p2[:n2], w2[0])
    for t in range(1, 9):
        acc2 = acc2 + mm(p2[t * n2:(t + 1) * n2], w2[t])
    a2 = jnp.maximum(acc2 + bias[4:5, 0:co], 0.0)   # (B*16, 32)

    # ---- conv3: same trick, output rows ordered (position, batch) ----
    p3 = mm(s3_ref[...], a2)                        # (9*4*B, 32)
    n3 = p3.shape[0] // 9
    acc3 = mm(p3[:n3], w3[0])
    for t in range(1, 9):
        acc3 = acc3 + mm(p3[t * n3:(t + 1) * n3], w3[t])
    a3 = jnp.maximum(acc3 + bias[5:6, 0:co], 0.0)   # (4*B, 32), rows = p*B + b

    # ---- GRUCell.  The flat 128-feature GEMM is decomposed into 4 block
    #      GEMMs (one per spatial position); torch's NCHW flatten permutation
    #      is folded into the row order of W_ih (row p*32+c <-> torch c*4+p).
    b_sz = hxo_ref.shape[0]
    h = hxo_ref.shape[1]
    g3 = 3 * h
    npos = a3.shape[0] // b_sz                      # 4
    c3 = a3.shape[1]                                # 32
    gi = bias[0:1, 0:g3]                            # b_ih
    for p in range(npos):
        gi = gi + mm(a3[p * b_sz:(p + 1) * b_sz], wbig_ref[pl.ds(p * c3, c3), :])
    off = npos * c3                                 # 128
    gh = mm(hx_ref[...], wbig_ref[pl.ds(off, h), :]) + bias[1:2, 0:g3]

    r = jax.nn.sigmoid(gi[:, :h] + gh[:, :h])
    z = jax.nn.sigmoid(gi[:, h:2 * h] + gh[:, h:2 * h])
    n = jnp.tanh(gi[:, 2 * h:] + r * gh[:, 2 * h:])     # b_hn stays inside r*(.)
    hx_new = (1.0 - z) * n + z * hx_ref[...]
    hxo_ref[...] = hx_new

    # ---- fused actor+critic head: one GEMM, cols = [actor logits | value | 0] ----
    hv = mm(hx_new, wbig_ref[pl.ds(off + h, h), :]) + bias[2:3, 0:g3]   # (B, 3h)
    na = logp_ref.shape[1]
    logits = hv[:, :na]
    m = jnp.max(logits, axis=-1, keepdims=True)
    s = logits - m
    logp_ref[...] = s - jnp.log(jnp.sum(jnp.exp(s), axis=-1, keepdims=True))
    value_ref[...] = hv[:, na:na + 1]


# ------------------------------------------------------------------ params

def init_params(key, channels, memsize, num_actions, batch):
    assert 3 * memsize <= 128, "bias slab assumes 3*memsize <= 128"
    assert num_actions + 1 <= 3 * memsize, "head packing assumes A+1 <= 3*memsize"

    ks = iter(random.split(key, 16))

    def uni(shape, bound):
        return random.uniform(next(ks), shape, jnp.float32, -bound, bound)

    c3 = 32
    # conv weights: rows/taps ordered (kh, kw, cin); biases gathered below.
    b1 = 1.0 / (channels * 9) ** 0.5
    b23 = 1.0 / (c3 * 9) ** 0.5
    w1 = uni((9 * channels, c3), b1)                # == HWIO reshaped
    w2 = uni((9, c3, c3), b23)                      # [tap, cin, cout]
    w3 = uni((9, c3, c3), b23)
    bconv = jnp.concatenate(
        [uni((1, c3), b1), uni((1, c3), b23), uni((1, c3), b23)], axis=0)   # (3, 32)

    # GRUCell(128, memsize).  Column blocks ordered (r, z, n).
    # wih row p*32 + c corresponds to torch weight_ih^T row c*4 + p
    # (the NCHW-flatten permutation folded into the weight layout at init).
    gb = 1.0 / memsize ** 0.5
    wih = uni((4 * c3, 3 * memsize), gb)
    whh = uni((memsize, 3 * memsize), gb)
    bgru = jnp.concatenate(
        [uni((1, 3 * memsize), gb), uni((1, 3 * memsize), gb)], axis=0)     # (2, 3h)

    # heads: columns [actor(num_actions) | critic(1)]
    hb = 1.0 / memsize ** 0.5
    whd = uni((memsize, num_actions + 1), hb)
    bhd = uni((1, num_actions + 1), hb)

    # ---- packed slabs consumed by the kernel (built once; fewer DMAs/call) ----
    w23 = jnp.stack([w2, w3], axis=0)                                       # (2,9,32,32)

    head_w = jnp.zeros((memsize, 3 * memsize), jnp.float32)
    head_w = head_w.at[:, :num_actions + 1].set(whd)
    wbig = jnp.concatenate([wih, whh, head_w], axis=0)      # (4*32 + 2*memsize, 3*memsize)

    bias = jnp.zeros((8, 128), jnp.float32)
    bias = bias.at[0, :3 * memsize].set(bgru[0])            # b_ih
    bias = bias.at[1, :3 * memsize].set(bgru[1])            # b_hh
    bias = bias.at[2, :num_actions + 1].set(bhd[0])         # [actor bias | critic bias]
    bias = bias.at[3, :c3].set(bconv[0])                    # conv1 bias
    bias = bias.at[4, :c3].set(bconv[1])                    # conv2 bias
    bias = bias.at[5, :c3].set(bconv[2])                    # conv3 bias

    # constant 0/1 gather matrices (batch-size specific, built once)
    s2 = make_conv_selector(batch, 8, 8, out_order="bp")    # (288, batch*64)
    s3 = make_conv_selector(batch, 4, 4, out_order="pb")    # (72,  batch*16)

    return dict(w1=w1, w2=w2, w3=w3, bconv=bconv, wih=wih, whh=whh, bgru=bgru,
                whd=whd, bhd=bhd, w23=w23, wbig=wbig, bias=bias, s2=s2, s3=s3)


# ----------------------------------------------------------------- wrapper

def a3c_policy_forward(visual_nchw, hx, params, num_actions):
    b = visual_nchw.shape[0]
    memsize = hx.shape[1]

    # input prep only: NCHW -> NHWC + im2col for conv1 (fused by XLA into the
    # kernel-input materialization; no inter-layer HBM traffic remains).
    x = jnp.transpose(visual_nchw, (0, 2, 3, 1)).astype(jnp.float32)
    xcol = conv1_im2col(x)                          # (B*64, 9*C)

    vmem = pl.BlockSpec(memory_space=pltpu.MemorySpace.VMEM)
    return pl.pallas_call(
        a3c_fused_kernel,
        out_shape=(
            jax.ShapeDtypeStruct((b, 1), jnp.float32),            # value
            jax.ShapeDtypeStruct((b, num_actions), jnp.float32),  # logp
            jax.ShapeDtypeStruct((b, memsize), jnp.float32),      # hx_new
        ),
        in_specs=[vmem] * 8,
        out_specs=(vmem, vmem, vmem),
        input_output_aliases={1: 2},                # hx buffer reused for hx_new
    )(xcol, hx, params["w1"], params["s2"], params["w23"], params["s3"],
      params["wbig"], params["bias"])


# --------------------------------------------------------------- reference

def reference_forward(visual_nchw, hx, params):
    """Plain-JAX reference mirroring the PyTorch module (communication=False)."""
    x = jnp.transpose(visual_nchw, (0, 2, 3, 1)).astype(jnp.float32)
    c_in = x.shape[-1]
    ws = [params["w1"].reshape(3, 3, c_in, 32),
          params["w2"].reshape(3, 3, 32, 32),
          params["w3"].reshape(3, 3, 32, 32)]
    for i, w in enumerate(ws):
        x = jax.lax.conv_general_dilated(
            x, w, window_strides=(2, 2), padding=((1, 1), (1, 1)),
            dimension_numbers=("NHWC", "HWIO", "NHWC"))
        x = jax.nn.relu(x + params["bconv"][i])
    # torch flatten order (NCHW): feature index = c*4 + h*2 + w
    feat = jnp.transpose(x, (0, 3, 1, 2)).reshape(x.shape[0], -1)
    h_dim = hx.shape[1]
    # undo the permutation folded into wih: torch row c*4+p <- our row p*32+c
    w_ih = params["wih"].reshape(4, 32, -1).transpose(1, 0, 2).reshape(128, -1)
    gi = feat @ w_ih + params["bgru"][0:1]
    gh = hx @ params["whh"] + params["bgru"][1:2]
    r = jax.nn.sigmoid(gi[:, :h_dim] + gh[:, :h_dim])
    z = jax.nn.sigmoid(gi[:, h_dim:2 * h_dim] + gh[:, h_dim:2 * h_dim])
    n = jnp.tanh(gi[:, 2 * h_dim:] + r * gh[:, 2 * h_dim:])
    hxn = (1.0 - z) * n + z * hx
    hv = hxn @ params["whd"] + params["bhd"]
    na = params["whd"].shape[1] - 1
    logp = jax.nn.log_softmax(hv[:, :na], axis=-1)
    value = hv[:, na:]
    return value, logp, hxn


# -------------------------------------------------------------------- main

if __name__ == "__main__":
    B, C, HW = 2, 4, 16           # 16 -> 8 -> 4 -> 2 spatial; 32*2*2 = 128
    memsize, num_actions = 32, 6

    key = random.PRNGKey(0)
    k_par, k_vis, k_hx = random.split(key, 3)
    params = init_params(k_par, C, memsize, num_actions, B)
    visual = random.normal(k_vis, (B, C, HW, HW), jnp.float32)   # NCHW like PyTorch
    hx = random.normal(k_hx, (B, memsize), jnp.float32)

    fwd = jax.jit(lambda v, h: a3c_policy_forward(v, h, params, num_actions))
    value, logp, hx_new = fwd(visual, hx)
    jax.block_until_ready((value, logp, hx_new))

    # structural sanity
    assert value.shape == (B, 1)
    assert logp.shape == (B, num_actions)
    assert hx_new.shape == (B, memsize)
    assert bool(jnp.all(jnp.isfinite(value)))
    assert bool(jnp.all(jnp.isfinite(logp)))
    assert bool(jnp.allclose(jnp.sum(jnp.exp(logp), axis=-1), 1.0, atol=1e-4))

    # numerical cross-check against a plain-JAX reference of the same module
    rv, rl, rh = reference_forward(visual, hx, params)
    assert bool(jnp.max(jnp.abs(value - rv)) < 3e-2)
    assert bool(jnp.max(jnp.abs(logp - rl)) < 3e-2)
    assert bool(jnp.max(jnp.abs(hx_new - rh)) < 3e-2)

    print("KERNEL_OK")
</pallas_src>

<mosaic_0001>
module attributes {stable_mosaic.version = 11 : i64} {
  func.func @a3c_fused_kernel(%arg0: memref<128x36xf32, #tpu.memory_space<vmem>>, %arg1: memref<2x32xf32, #tpu.memory_space<vmem>>, %arg2: memref<36x32xf32, #tpu.memory_space<vmem>>, %arg3: memref<288x128xf32, #tpu.memory_space<vmem>>, %arg4: memref<2x9x32x32xf32, #tpu.memory_space<vmem>>, %arg5: memref<72x32xf32, #tpu.memory_space<vmem>>, %arg6: memref<192x96xf32, #tpu.memory_space<vmem>>, %arg7: memref<8x128xf32, #tpu.memory_space<vmem>>, %arg8: memref<2x1xf32, #tpu.memory_space<vmem>>, %arg9: memref<2x6xf32, #tpu.memory_space<vmem>>, %arg10: memref<2x32xf32, #tpu.memory_space<vmem>>) attributes {dimension_semantics = [], scalar_prefetch = 0 : i64, scratch_operands = 0 : i64, tpu.core_type = #tpu.core_type<tc>} {
    %c0 = arith.constant 0 : index
    %c0_0 = arith.constant 0 : index
    %0 = vector.load %arg7[%c0, %c0_0] : memref<8x128xf32, #tpu.memory_space<vmem>>, vector<8x128xf32>
    %c0_1 = arith.constant 0 : index
    %c0_2 = arith.constant 0 : index
    %c0_3 = arith.constant 0 : index
    %c0_4 = arith.constant 0 : index
    %1 = vector.load %arg4[%c0_1, %c0_2, %c0_3, %c0_4] : memref<2x9x32x32xf32, #tpu.memory_space<vmem>>, vector<1x9x32x32xf32>
    %2 = vector.shape_cast %1 : vector<1x9x32x32xf32> to vector<9x32x32xf32>
    %c1 = arith.constant 1 : index
    %c0_5 = arith.constant 0 : index
    %c0_6 = arith.constant 0 : index
    %c0_7 = arith.constant 0 : index
    %3 = vector.load %arg4[%c1, %c0_5, %c0_6, %c0_7] : memref<2x9x32x32xf32, #tpu.memory_space<vmem>>, vector<1x9x32x32xf32>
    %4 = vector.shape_cast %3 : vector<1x9x32x32xf32> to vector<9x32x32xf32>
    %c0_8 = arith.constant 0 : index
    %c0_9 = arith.constant 0 : index
    %5 = vector.load %arg0[%c0_8, %c0_9] : memref<128x36xf32, #tpu.memory_space<vmem>>, vector<128x36xf32>
    %c0_10 = arith.constant 0 : index
    %c0_11 = arith.constant 0 : index
    %6 = vector.load %arg2[%c0_10, %c0_11] : memref<36x32xf32, #tpu.memory_space<vmem>>, vector<36x32xf32>
    %cst = arith.constant dense<0.000000e+00> : vector<128x32xf32>
    %7 = tpu.matmul %5, %6, %cst {dimension_numbers = #tpu.dot_dimension_numbers<[1], [0], [0], [1], [0, 0, 1, 1], [], []>} : vector<128x36xf32>, vector<36x32xf32>, vector<128x32xf32> -> vector<128x32xf32>
    %8 = vector.extract_strided_slice %0 {offsets = [3, 0], sizes = [1, 32], strides = [1, 1]} : vector<8x128xf32> to vector<1x32xf32>
    %9 = vector.broadcast %8 : vector<1x32xf32> to vector<128x32xf32>
    %10 = arith.addf %7, %9 : vector<128x32xf32>
    %cst_12 = arith.constant 0.000000e+00 : f32
    %11 = vector.broadcast %cst_12 : f32 to vector<128x32xf32>
    %12 = arith.maximumf %10, %11 : vector<128x32xf32>
    %c0_13 = arith.constant 0 : index
    %c0_14 = arith.constant 0 : index
    %13 = vector.load %arg3[%c0_13, %c0_14] : memref<288x128xf32, #tpu.memory_space<vmem>>, vector<288x128xf32>
    %cst_15 = arith.constant dense<0.000000e+00> : vector<288x32xf32>
    %14 = tpu.matmul %13, %12, %cst_15 {dimension_numbers = #tpu.dot_dimension_numbers<[1], [0], [0], [1], [0, 0, 1, 1], [], []>} : vector<288x128xf32>, vector<128x32xf32>, vector<288x32xf32> -> vector<288x32xf32>
    %15 = vector.extract_strided_slice %14 {offsets = [0, 0], sizes = [32, 32], strides = [1, 1]} : vector<288x32xf32> to vector<32x32xf32>
    %16 = vector.extract_strided_slice %2 {offsets = [0, 0, 0], sizes = [1, 32, 32], strides = [1, 1, 1]} : vector<9x32x32xf32> to vector<1x32x32xf32>
    %17 = vector.shape_cast %16 : vector<1x32x32xf32> to vector<32x32xf32>
    %cst_16 = arith.constant dense<0.000000e+00> : vector<32x32xf32>
    %18 = tpu.matmul %15, %17, %cst_16 {dimension_numbers = #tpu.dot_dimension_numbers<[1], [0], [0], [1], [0, 0, 1, 1], [], []>} : vector<32x32xf32>, vector<32x32xf32>, vector<32x32xf32> -> vector<32x32xf32>
    %19 = vector.extract_strided_slice %14 {offsets = [32, 0], sizes = [32, 32], strides = [1, 1]} : vector<288x32xf32> to vector<32x32xf32>
    %20 = vector.extract_strided_slice %2 {offsets = [1, 0, 0], sizes = [1, 32, 32], strides = [1, 1, 1]} : vector<9x32x32xf32> to vector<1x32x32xf32>
    %21 = vector.shape_cast %20 : vector<1x32x32xf32> to vector<32x32xf32>
    %cst_17 = arith.constant dense<0.000000e+00> : vector<32x32xf32>
    %22 = tpu.matmul %19, %21, %cst_17 {dimension_numbers = #tpu.dot_dimension_numbers<[1], [0], [0], [1], [0, 0, 1, 1], [], []>} : vector<32x32xf32>, vector<32x32xf32>, vector<32x32xf32> -> vector<32x32xf32>
    %23 = arith.addf %18, %22 : vector<32x32xf32>
    %24 = vector.extract_strided_slice %14 {offsets = [64, 0], sizes = [32, 32], strides = [1, 1]} : vector<288x32xf32> to vector<32x32xf32>
    %25 = vector.extract_strided_slice %2 {offsets = [2, 0, 0], sizes = [1, 32, 32], strides = [1, 1, 1]} : vector<9x32x32xf32> to vector<1x32x32xf32>
    %26 = vector.shape_cast %25 : vector<1x32x32xf32> to vector<32x32xf32>
    %cst_18 = arith.constant dense<0.000000e+00> : vector<32x32xf32>
    %27 = tpu.matmul %24, %26, %cst_18 {dimension_numbers = #tpu.dot_dimension_numbers<[1], [0], [0], [1], [0, 0, 1, 1], [], []>} : vector<32x32xf32>, vector<32x32xf32>, vector<32x32xf32> -> vector<32x32xf32>
    %28 = arith.addf %23, %27 : vector<32x32xf32>
    %29 = vector.extract_strided_slice %14 {offsets = [96, 0], sizes = [32, 32], strides = [1, 1]} : vector<288x32xf32> to vector<32x32xf32>
    %30 = vector.extract_strided_slice %2 {offsets = [3, 0, 0], sizes = [1, 32, 32], strides = [1, 1, 1]} : vector<9x32x32xf32> to vector<1x32x32xf32>
    %31 = vector.shape_cast %30 : vector<1x32x32xf32> to vector<32x32xf32>
    %cst_19 = arith.constant dense<0.000000e+00> : vector<32x32xf32>
    %32 = tpu.matmul %29, %31, %cst_19 {dimension_numbers = #tpu.dot_dimension_numbers<[1], [0], [0], [1], [0, 0, 1, 1], [], []>} : vector<32x32xf32>, vector<32x32xf32>, vector<32x32xf32> -> vector<32x32xf32>
    %33 = arith.addf %28, %32 : vector<32x32xf32>
    %34 = vector.extract_strided_slice %14 {offsets = [128, 0], sizes = [32, 32], strides = [1, 1]} : vector<288x32xf32> to vector<32x32xf32>
    %35 = vector.extract_strided_slice %2 {offsets = [4, 0, 0], sizes = [1, 32, 32], strides = [1, 1, 1]} : vector<9x32x32xf32> to vector<1x32x32xf32>
    %36 = vector.shape_cast %35 : vector<1x32x32xf32> to vector<32x32xf32>
    %cst_20 = arith.constant dense<0.000000e+00> : vector<32x32xf32>
    %37 = tpu.matmul %34, %36, %cst_20 {dimension_numbers = #tpu.dot_dimension_numbers<[1], [0], [0], [1], [0, 0, 1, 1], [], []>} : vector<32x32xf32>, vector<32x32xf32>, vector<32x32xf32> -> vector<32x32xf32>
    %38 = arith.addf %33, %37 : vector<32x32xf32>
    %39 = vector.extract_strided_slice %14 {offsets = [160, 0], sizes = [32, 32], strides = [1, 1]} : vector<288x32xf32> to vector<32x32xf32>
    %40 = vector.extract_strided_slice %2 {offsets = [5, 0, 0], sizes = [1, 32, 32], strides = [1, 1, 1]} : vector<9x32x32xf32> to vector<1x32x32xf32>
    %41 = vector.shape_cast %40 : vector<1x32x32xf32> to vector<32x32xf32>
    %cst_21 = arith.constant dense<0.000000e+00> : vector<32x32xf32>
    %42 = tpu.matmul %39, %41, %cst_21 {dimension_numbers = #tpu.dot_dimension_numbers<[1], [0], [0], [1], [0, 0, 1, 1], [], []>} : vector<32x32xf32>, vector<32x32xf32>, vector<32x32xf32> -> vector<32x32xf32>
    %43 = arith.addf %38, %42 : vector<32x32xf32>
    %44 = vector.extract_strided_slice %14 {offsets = [192, 0], sizes = [32, 32], strides = [1, 1]} : vector<288x32xf32> to vector<32x32xf32>
    %45 = vector.extract_strided_slice %2 {offsets = [6, 0, 0], sizes = [1, 32, 32], strides = [1, 1, 1]} : vector<9x32x32xf32> to vector<1x32x32xf32>
    %46 = vector.shape_cast %45 : vector<1x32x32xf32> to vector<32x32xf32>
    %cst_22 = arith.constant dense<0.000000e+00> : vector<32x32xf32>
    %47 = tpu.matmul %44, %46, %cst_22 {dimension_numbers = #tpu.dot_dimension_numbers<[1], [0], [0], [1], [0, 0, 1, 1], [], []>} : vector<32x32xf32>, vector<32x32xf32>, vector<32x32xf32> -> vector<32x32xf32>
    %48 = arith.addf %43, %47 : vector<32x32xf32>
    %49 = vector.extract_strided_slice %14 {offsets = [224, 0], sizes = [32, 32], strides = [1, 1]} : vector<288x32xf32> to vector<32x32xf32>
    %50 = vector.extract_strided_slice %2 {offsets = [7, 0, 0], sizes = [1, 32, 32], strides = [1, 1, 1]} : vector<9x32x32xf32> to vector<1x32x32xf32>
    %51 = vector.shape_cast %50 : vector<1x32x32xf32> to vector<32x32xf32>
    %cst_23 = arith.constant dense<0.000000e+00> : vector<32x32xf32>
    %52 = tpu.matmul %49, %51, %cst_23 {dimension_numbers = #tpu.dot_dimension_numbers<[1], [0], [0], [1], [0, 0, 1, 1], [], []>} : vector<32x32xf32>, vector<32x32xf32>, vector<32x32xf32> -> vector<32x32xf32>
    %53 = arith.addf %48, %52 : vector<32x32xf32>
    %54 = vector.extract_strided_slice %14 {offsets = [256, 0], sizes = [32, 32], strides = [1, 1]} : vector<288x32xf32> to vector<32x32xf32>
    %55 = vector.extract_strided_slice %2 {offsets = [8, 0, 0], sizes = [1, 32, 32], strides = [1, 1, 1]} : vector<9x32x32xf32> to vector<1x32x32xf32>
    %56 = vector.shape_cast %55 : vector<1x32x32xf32> to vector<32x32xf32>
    %cst_24 = arith.constant dense<0.000000e+00> : vector<32x32xf32>
    %57 = tpu.matmul %54, %56, %cst_24 {dimension_numbers = #tpu.dot_dimension_numbers<[1], [0], [0], [1], [0, 0, 1, 1], [], []>} : vector<32x32xf32>, vector<32x32xf32>, vector<32x32xf32> -> vector<32x32xf32>
    %58 = arith.addf %53, %57 : vector<32x32xf32>
    %59 = vector.extract_strided_slice %0 {offsets = [4, 0], sizes = [1, 32], strides = [1, 1]} : vector<8x128xf32> to vector<1x32xf32>
    %60 = vector.broadcast %59 : vector<1x32xf32> to vector<32x32xf32>
    %61 = arith.addf %58, %60 : vector<32x32xf32>
    %cst_25 = arith.constant 0.000000e+00 : f32
    %62 = vector.broadcast %cst_25 : f32 to vector<32x32xf32>
    %63 = arith.maximumf %61, %62 : vector<32x32xf32>
    %c0_26 = arith.constant 0 : index
    %c0_27 = arith.constant 0 : index
    %64 = vector.load %arg5[%c0_26, %c0_27] : memref<72x32xf32, #tpu.memory_space<vmem>>, vector<72x32xf32>
    %cst_28 = arith.constant dense<0.000000e+00> : vector<72x32xf32>
    %65 = tpu.matmul %64, %63, %cst_28 {dimension_numbers = #tpu.dot_dimension_numbers<[1], [0], [0], [1], [0, 0, 1, 1], [], []>} : vector<72x32xf32>, vector<32x32xf32>, vector<72x32xf32> -> vector<72x32xf32>
    %66 = vector.extract_strided_slice %65 {offsets = [0, 0], sizes = [8, 32], strides = [1, 1]} : vector<72x32xf32> to vector<8x32xf32>
    %67 = vector.extract_strided_slice %4 {offsets = [0, 0, 0], sizes = [1, 32, 32], strides = [1, 1, 1]} : vector<9x32x32xf32> to vector<1x32x32xf32>
    %68 = vector.shape_cast %67 : vector<1x32x32xf32> to vector<32x32xf32>
    %cst_29 = arith.constant dense<0.000000e+00> : vector<8x32xf32>
    %69 = tpu.matmul %66, %68, %cst_29 {dimension_numbers = #tpu.dot_dimension_numbers<[1], [0], [0], [1], [0, 0, 1, 1], [], []>} : vector<8x32xf32>, vector<32x32xf32>, vector<8x32xf32> -> vector<8x32xf32>
    %70 = vector.extract_strided_slice %65 {offsets = [8, 0], sizes = [8, 32], strides = [1, 1]} : vector<72x32xf32> to vector<8x32xf32>
    %71 = vector.extract_strided_slice %4 {offsets = [1, 0, 0], sizes = [1, 32, 32], strides = [1, 1, 1]} : vector<9x32x32xf32> to vector<1x32x32xf32>
    %72 = vector.shape_cast %71 : vector<1x32x32xf32> to vector<32x32xf32>
    %cst_30 = arith.constant dense<0.000000e+00> : vector<8x32xf32>
    %73 = tpu.matmul %70, %72, %cst_30 {dimension_numbers = #tpu.dot_dimension_numbers<[1], [0], [0], [1], [0, 0, 1, 1], [], []>} : vector<8x32xf32>, vector<32x32xf32>, vector<8x32xf32> -> vector<8x32xf32>
    %74 = arith.addf %69, %73 : vector<8x32xf32>
    %75 = vector.extract_strided_slice %65 {offsets = [16, 0], sizes = [8, 32], strides = [1, 1]} : vector<72x32xf32> to vector<8x32xf32>
    %76 = vector.extract_strided_slice %4 {offsets = [2, 0, 0], sizes = [1, 32, 32], strides = [1, 1, 1]} : vector<9x32x32xf32> to vector<1x32x32xf32>
    %77 = vector.shape_cast %76 : vector<1x32x32xf32> to vector<32x32xf32>
    %cst_31 = arith.constant dense<0.000000e+00> : vector<8x32xf32>
    %78 = tpu.matmul %75, %77, %cst_31 {dimension_numbers = #tpu.dot_dimension_numbers<[1], [0], [0], [1], [0, 0, 1, 1], [], []>} : vector<8x32xf32>, vector<32x32xf32>, vector<8x32xf32> -> vector<8x32xf32>
    %79 = arith.addf %74, %78 : vector<8x32xf32>
    %80 = vector.extract_strided_slice %65 {offsets = [24, 0], sizes = [8, 32], strides = [1, 1]} : vector<72x32xf32> to vector<8x32xf32>
    %81 = vector.extract_strided_slice %4 {offsets = [3, 0, 0], sizes = [1, 32, 32], strides = [1, 1, 1]} : vector<9x32x32xf32> to vector<1x32x32xf32>
    %82 = vector.shape_cast %81 : vector<1x32x32xf32> to vector<32x32xf32>
    %cst_32 = arith.constant dense<0.000000e+00> : vector<8x32xf32>
    %83 = tpu.matmul %80, %82, %cst_32 {dimension_numbers = #tpu.dot_dimension_numbers<[1], [0], [0], [1], [0, 0, 1, 1], [], []>} : vector<8x32xf32>, vector<32x32xf32>, vector<8x32xf32> -> vector<8x32xf32>
    %84 = arith.addf %79, %83 : vector<8x32xf32>
    %85 = vector.extract_strided_slice %65 {offsets = [32, 0], sizes = [8, 32], strides = [1, 1]} : vector<72x32xf32> to vector<8x32xf32>
    %86 = vector.extract_strided_slice %4 {offsets = [4, 0, 0], sizes = [1, 32, 32], strides = [1, 1, 1]} : vector<9x32x32xf32> to vector<1x32x32xf32>
    %87 = vector.shape_cast %86 : vector<1x32x32xf32> to vector<32x32xf32>
    %cst_33 = arith.constant dense<0.000000e+00> : vector<8x32xf32>
    %88 = tpu.matmul %85, %87, %cst_33 {dimension_numbers = #tpu.dot_dimension_numbers<[1], [0], [0], [1], [0, 0, 1, 1], [], []>} : vector<8x32xf32>, vector<32x32xf32>, vector<8x32xf32> -> vector<8x32xf32>
    %89 = arith.addf %84, %88 : vector<8x32xf32>
    %90 = vector.extract_strided_slice %65 {offsets = [40, 0], sizes = [8, 32], strides = [1, 1]} : vector<72x32xf32> to vector<8x32xf32>
    %91 = vector.extract_strided_slice %4 {offsets = [5, 0, 0], sizes = [1, 32, 32], strides = [1, 1, 1]} : vector<9x32x32xf32> to vector<1x32x32xf32>
    %92 = vector.shape_cast %91 : vector<1x32x32xf32> to vector<32x32xf32>
    %cst_34 = arith.constant dense<0.000000e+00> : vector<8x32xf32>
    %93 = tpu.matmul %90, %92, %cst_34 {dimension_numbers = #tpu.dot_dimension_numbers<[1], [0], [0], [1], [0, 0, 1, 1], [], []>} : vector<8x32xf32>, vector<32x32xf32>, vector<8x32xf32> -> vector<8x32xf32>
    %94 = arith.addf %89, %93 : vector<8x32xf32>
    %95 = vector.extract_strided_slice %65 {offsets = [48, 0], sizes = [8, 32], strides = [1, 1]} : vector<72x32xf32> to vector<8x32xf32>
    %96 = vector.extract_strided_slice %4 {offsets = [6, 0, 0], sizes = [1, 32, 32], strides = [1, 1, 1]} : vector<9x32x32xf32> to vector<1x32x32xf32>
    %97 = vector.shape_cast %96 : vector<1x32x32xf32> to vector<32x32xf32>
    %cst_35 = arith.constant dense<0.000000e+00> : vector<8x32xf32>
    %98 = tpu.matmul %95, %97, %cst_35 {dimension_numbers = #tpu.dot_dimension_numbers<[1], [0], [0], [1], [0, 0, 1, 1], [], []>} : vector<8x32xf32>, vector<32x32xf32>, vector<8x32xf32> -> vector<8x32xf32>
    %99 = arith.addf %94, %98 : vector<8x32xf32>
    %100 = vector.extract_strided_slice %65 {offsets = [56, 0], sizes = [8, 32], strides = [1, 1]} : vector<72x32xf32> to vector<8x32xf32>
    %101 = vector.extract_strided_slice %4 {offsets = [7, 0, 0], sizes = [1, 32, 32], strides = [1, 1, 1]} : vector<9x32x32xf32> to vector<1x32x32xf32>
    %102 = vector.shape_cast %101 : vector<1x32x32xf32> to vector<32x32xf32>
    %cst_36 = arith.constant dense<0.000000e+00> : vector<8x32xf32>
    %103 = tpu.matmul %100, %102, %cst_36 {dimension_numbers = #tpu.dot_dimension_numbers<[1], [0], [0], [1], [0, 0, 1, 1], [], []>} : vector<8x32xf32>, vector<32x32xf32>, vector<8x32xf32> -> vector<8x32xf32>
    %104 = arith.addf %99, %103 : vector<8x32xf32>
    %105 = vector.extract_strided_slice %65 {offsets = [64, 0], sizes = [8, 32], strides = [1, 1]} : vector<72x32xf32> to vector<8x32xf32>
    %106 = vector.extract_strided_slice %4 {offsets = [8, 0, 0], sizes = [1, 32, 32], strides = [1, 1, 1]} : vector<9x32x32xf32> to vector<1x32x32xf32>
    %107 = vector.shape_cast %106 : vector<1x32x32xf32> to vector<32x32xf32>
    %cst_37 = arith.constant dense<0.000000e+00> : vector<8x32xf32>
    %108 = tpu.matmul %105, %107, %cst_37 {dimension_numbers = #tpu.dot_dimension_numbers<[1], [0], [0], [1], [0, 0, 1, 1], [], []>} : vector<8x32xf32>, vector<32x32xf32>, vector<8x32xf32> -> vector<8x32xf32>
    %109 = arith.addf %104, %108 : vector<8x32xf32>
    %110 = vector.extract_strided_slice %0 {offsets = [5, 0], sizes = [1, 32], strides = [1, 1]} : vector<8x128xf32> to vector<1x32xf32>
    %111 = vector.broadcast %110 : vector<1x32xf32> to vector<8x32xf32>
    %112 = arith.addf %109, %111 : vector<8x32xf32>
    %cst_38 = arith.constant 0.000000e+00 : f32
    %113 = vector.broadcast %cst_38 : f32 to vector<8x32xf32>
    %114 = arith.maximumf %112, %113 : vector<8x32xf32>
    %115 = vector.extract_strided_slice %0 {offsets = [0, 0], sizes = [1, 96], strides = [1, 1]} : vector<8x128xf32> to vector<1x96xf32>
    %116 = vector.extract_strided_slice %114 {offsets = [0, 0], sizes = [2, 32], strides = [1, 1]} : vector<8x32xf32> to vector<2x32xf32>
    %c0_39 = arith.constant 0 : index
    %c0_40 = arith.constant 0 : index
    %117 = vector.load %arg6[%c0_39, %c0_40] : memref<192x96xf32, #tpu.memory_space<vmem>>, vector<32x96xf32>
    %cst_41 = arith.constant dense<0.000000e+00> : vector<2x96xf32>
    %118 = tpu.matmul %116, %117, %cst_41 {dimension_numbers = #tpu.dot_dimension_numbers<[1], [0], [0], [1], [0, 0, 1, 1], [], []>} : vector<2x32xf32>, vector<32x96xf32>, vector<2x96xf32> -> vector<2x96xf32>
    %119 = vector.broadcast %115 : vector<1x96xf32> to vector<2x96xf32>
    %120 = arith.addf %119, %118 : vector<2x96xf32>
    %121 = vector.extract_strided_slice %114 {offsets = [2, 0], sizes = [2, 32], strides = [1, 1]} : vector<8x32xf32> to vector<2x32xf32>
    %c32 = arith.constant 32 : index
    %c0_42 = arith.constant 0 : index
    %122 = vector.load %arg6[%c32, %c0_42] : memref<192x96xf32, #tpu.memory_space<vmem>>, vector<32x96xf32>
    %cst_43 = arith.constant dense<0.000000e+00> : vector<2x96xf32>
    %123 = tpu.matmul %121, %122, %cst_43 {dimension_numbers = #tpu.dot_dimension_numbers<[1], [0], [0], [1], [0, 0, 1, 1], [], []>} : vector<2x32xf32>, vector<32x96xf32>, vector<2x96xf32> -> vector<2x96xf32>
    %124 = arith.addf %120, %123 : vector<2x96xf32>
    %125 = vector.extract_strided_slice %114 {offsets = [4, 0], sizes = [2, 32], strides = [1, 1]} : vector<8x32xf32> to vector<2x32xf32>
    %c64 = arith.constant 64 : index
    %c0_44 = arith.constant 0 : index
    %126 = vector.load %arg6[%c64, %c0_44] : memref<192x96xf32, #tpu.memory_space<vmem>>, vector<32x96xf32>
    %cst_45 = arith.constant dense<0.000000e+00> : vector<2x96xf32>
    %127 = tpu.matmul %125, %126, %cst_45 {dimension_numbers = #tpu.dot_dimension_numbers<[1], [0], [0], [1], [0, 0, 1, 1], [], []>} : vector<2x32xf32>, vector<32x96xf32>, vector<2x96xf32> -> vector<2x96xf32>
    %128 = arith.addf %124, %127 : vector<2x96xf32>
    %129 = vector.extract_strided_slice %114 {offsets = [6, 0], sizes = [2, 32], strides = [1, 1]} : vector<8x32xf32> to vector<2x32xf32>
    %c96 = arith.constant 96 : index
    %c0_46 = arith.constant 0 : index
    %130 = vector.load %arg6[%c96, %c0_46] : memref<192x96xf32, #tpu.memory_space<vmem>>, vector<32x96xf32>
    %cst_47 = arith.constant dense<0.000000e+00> : vector<2x96xf32>
    %131 = tpu.matmul %129, %130, %cst_47 {dimension_numbers = #tpu.dot_dimension_numbers<[1], [0], [0], [1], [0, 0, 1, 1], [], []>} : vector<2x32xf32>, vector<32x96xf32>, vector<2x96xf32> -> vector<2x96xf32>
    %132 = arith.addf %128, %131 : vector<2x96xf32>
    %c0_48 = arith.constant 0 : index
    %c0_49 = arith.constant 0 : index
    %133 = vector.load %arg1[%c0_48, %c0_49] : memref<2x32xf32, #tpu.memory_space<vmem>>, vector<2x32xf32>
    %c128 = arith.constant 128 : index
    %c0_50 = arith.constant 0 : index
    %134 = vector.load %arg6[%c128, %c0_50] : memref<192x96xf32, #tpu.memory_space<vmem>>, vector<32x96xf32>
    %cst_51 = arith.constant dense<0.000000e+00> : vector<2x96xf32>
    %135 = tpu.matmul %133, %134, %cst_51 {dimension_numbers = #tpu.dot_dimension_numbers<[1], [0], [0], [1], [0, 0, 1, 1], [], []>} : vector<2x32xf32>, vector<32x96xf32>, vector<2x96xf32> -> vector<2x96xf32>
    %136 = vector.extract_strided_slice %0 {offsets = [1, 0], sizes = [1, 96], strides = [1, 1]} : vector<8x128xf32> to vector<1x96xf32>
    %137 = vector.broadcast %136 : vector<1x96xf32> to vector<2x96xf32>
    %138 = arith.addf %135, %137 : vector<2x96xf32>
    %139 = vector.extract_strided_slice %132 {offsets = [0, 0], sizes = [2, 32], strides = [1, 1]} : vector<2x96xf32> to vector<2x32xf32>
    %140 = vector.extract_strided_slice %138 {offsets = [0, 0], sizes = [2, 32], strides = [1, 1]} : vector<2x96xf32> to vector<2x32xf32>
    %141 = arith.addf %139, %140 : vector<2x32xf32>
    %142 = arith.negf %141 : vector<2x32xf32>
    %143 = math.exp %142 : vector<2x32xf32>
    %cst_52 = arith.constant 1.000000e+00 : f32
    %144 = vector.broadcast %cst_52 : f32 to vector<2x32xf32>
    %145 = arith.addf %144, %143 : vector<2x32xf32>
    %146 = arith.divf %144, %145 : vector<2x32xf32>
    %147 = vector.extract_strided_slice %132 {offsets = [0, 32], sizes = [2, 32], strides = [1, 1]} : vector<2x96xf32> to vector<2x32xf32>
    %148 = vector.extract_strided_slice %138 {offsets = [0, 32], sizes = [2, 32], strides = [1, 1]} : vector<2x96xf32> to vector<2x32xf32>
    %149 = arith.addf %147, %148 : vector<2x32xf32>
    %150 = arith.negf %149 : vector<2x32xf32>
    %151 = math.exp %150 : vector<2x32xf32>
    %cst_53 = arith.constant 1.000000e+00 : f32
    %152 = vector.broadcast %cst_53 : f32 to vector<2x32xf32>
    %153 = arith.addf %152, %151 : vector<2x32xf32>
    %154 = arith.divf %152, %153 : vector<2x32xf32>
    %155 = vector.extract_strided_slice %132 {offsets = [0, 64], sizes = [2, 32], strides = [1, 1]} : vector<2x96xf32> to vector<2x32xf32>
    %156 = vector.extract_strided_slice %138 {offsets = [0, 64], sizes = [2, 32], strides = [1, 1]} : vector<2x96xf32> to vector<2x32xf32>
    %157 = arith.mulf %146, %156 : vector<2x32xf32>
    %158 = arith.addf %155, %157 : vector<2x32xf32>
    %159 = math.tanh %158 : vector<2x32xf32>
    %cst_54 = arith.constant 1.000000e+00 : f32
    %160 = vector.broadcast %cst_54 : f32 to vector<2x32xf32>
    %161 = arith.subf %160, %154 : vector<2x32xf32>
    %162 = arith.mulf %161, %159 : vector<2x32xf32>
    %c0_55 = arith.constant 0 : index
    %c0_56 = arith.constant 0 : index
    %163 = vector.load %arg1[%c0_55, %c0_56] : memref<2x32xf32, #tpu.memory_space<vmem>>, vector<2x32xf32>
    %164 = arith.mulf %154, %163 : vector<2x32xf32>
    %165 = arith.addf %162, %164 : vector<2x32xf32>
    %c0_57 = arith.constant 0 : index
    %c0_58 = arith.constant 0 : index
    %166 = vector.load %arg10[%c0_57, %c0_58] : memref<2x32xf32, #tpu.memory_space<vmem>>, vector<2x32xf32>
    tpu.vector_store %arg10[%c0_57, %c0_58], %165 {strides = array<i32>} : memref<2x32xf32, #tpu.memory_space<vmem>>, vector<2x32xf32>,
    %c160 = arith.constant 160 : index
    %c0_59 = arith.constant 0 : index
    %167 = vector.load %arg6[%c160, %c0_59] : memref<192x96xf32, #tpu.memory_space<vmem>>, vector<32x96xf32>
    %cst_60 = arith.constant dense<0.000000e+00> : vector<2x96xf32>
    %168 = tpu.matmul %165, %167, %cst_60 {dimension_numbers = #tpu.dot_dimension_numbers<[1], [0], [0], [1], [0, 0, 1, 1], [], []>} : vector<2x32xf32>, vector<32x96xf32>, vector<2x96xf32> -> vector<2x96xf32>
    %169 = vector.extract_strided_slice %0 {offsets = [2, 0], sizes = [1, 96], strides = [1, 1]} : vector<8x128xf32> to vector<1x96xf32>
    %170 = vector.broadcast %169 : vector<1x96xf32> to vector<2x96xf32>
    %171 = arith.addf %168, %170 : vector<2x96xf32>
    %172 = vector.extract_strided_slice %171 {offsets = [0, 0], sizes = [2, 6], strides = [1, 1]} : vector<2x96xf32> to vector<2x6xf32>
    %cst_61 = arith.constant dense<0xFF800000> : vector<2xf32>
    %173 = vector.multi_reduction <maximumf>, %172, %cst_61 [1] : vector<2x6xf32> to vector<2xf32>
    %174 = vector.shape_cast %173 : vector<2xf32> to vector<2x1xf32>
    %175 = vector.broadcast %174 : vector<2x1xf32> to vector<2x6xf32>
    %176 = arith.subf %172, %175 : vector<2x6xf32>
    %177 = math.exp %176 : vector<2x6xf32>
    %cst_62 = arith.constant dense<0.000000e+00> : vector<2xf32>
    %178 = vector.multi_reduction <add>, %177, %cst_62 [1] : vector<2x6xf32> to vector<2xf32>
    %179 = vector.shape_cast %178 : vector<2xf32> to vector<2x1xf32>
    %180 = math.log %179 : vector<2x1xf32>
    %181 = vector.broadcast %180 : vector<2x1xf32> to vector<2x6xf32>
    %182 = arith.subf %176, %181 : vector<2x6xf32>
    %c0_63 = arith.constant 0 : index
    %c0_64 = arith.constant 0 : index
    %183 = vector.load %arg9[%c0_63, %c0_64] : memref<2x6xf32, #tpu.memory_space<vmem>>, vector<2x6xf32>
    tpu.vector_store %arg9[%c0_63, %c0_64], %182 {strides = array<i32>} : memref<2x6xf32, #tpu.memory_space<vmem>>, vector<2x6xf32>,
    %184 = vector.extract_strided_slice %171 {offsets = [0, 6], sizes = [2, 1], strides = [1, 1]} : vector<2x96xf32> to vector<2x1xf32>
    %c0_65 = arith.constant 0 : index
    %c0_66 = arith.constant 0 : index
    %185 = vector.load %arg8[%c0_65, %c0_66] : memref<2x1xf32, #tpu.memory_space<vmem>>, vector<2x1xf32>
    tpu.vector_store %arg8[%c0_65, %c0_66], %184 {strides = array<i32>} : memref<2x1xf32, #tpu.memory_space<vmem>>, vector<2x1xf32>,
    return
  }
}

</mosaic_0001>

<bundles_post_ra>
// kernel: _lambda_.1
= control target key start
LH: loop header
LB: loop body
LE: loop exit
PB: predicated region body
PF: predicated region fallthrough
CT: control target
= control target key end

     0   :  { %vm132_vm0 = vcmask 293888   ;;  %vm181_vm1 = vcmask 1043456   ;;  %s4772_s0 = inlined_call_operand.vmem [shape: f32[128,36], index: 0, kind: input, shape index: {}]   ;;  %s4773_s1 = inlined_call_operand.vmem [shape: f32[2,32], index: 1, kind: input, shape index: {}, may-alias: {1,10}]   ;;  %s4774_s2 = inlined_call_operand.vmem [shape: f32[36,32], index: 2, kind: input, shape index: {}]   ;;  %s4775_s3 = inlined_call_operand.vmem [shape: f32[288,128], index: 3, kind: input, shape index: {}]   ;;  %s4776_s4 = inlined_call_operand.vmem [shape: f32[2,9,32,32], index: 4, kind: input, shape index: {}]   ;;  %s4777_s5 = inlined_call_operand.vmem [shape: f32[72,32], index: 5, kind: input, shape index: {}]   ;;  %s4778_s6 = inlined_call_operand.vmem [shape: f32[192,96], index: 6, kind: input, shape index: {}]   ;;  %s4779_s7 = inlined_call_operand.vmem [shape: f32[8,128], index: 7, kind: input, shape index: {}]   ;;  %s4780_s8 = inlined_call_operand.vmem [shape: f32[2,1], index: 8, kind: output, shape index: {0}]   ;;  %s4781_s9 = inlined_call_operand.hbm [shape: f32[2,6], index: 9, kind: output, shape index: {1}]   ;;  %s4782_s10 = inlined_call_operand.vmem [shape: f32[2,32], index: 10, kind: output, shape index: {2}, may-alias: {1,10}]  }
   0x1   :  { %v123_v0 = vld [vmem:[%s4774_s2] sm:$0xff]  ;;  %v124_v1 = vld [vmem:[%s4774_s2 + $0x8] sm:$0xff]  ;;  %v125_v2 = vld [vmem:[%s4774_s2 + $0x10] sm:$0xff] }
   0x2   :  { %v3705_v3 = vpack.c.bf16 %v124_v1, %v123_v0  ;;  %v126_v4 = vld [vmem:[%s4774_s2 + $0x18] sm:$0xff]  ;;  %v107_v5 = vld [vmem:[%s4772_s0] sm:$0xff] }
   0x3   :  { %v3709_v6 = vpack.c.bf16 %v126_v4, %v125_v2  ;;  %3269 = vmatprep.mubr.msk.f32.mxu0 %vm132_vm0, %v107_v5  ;;  %v127_v7 = vld [vmem:[%s4774_s2 + $0x20] sm:$0xf] }
   0x4   :  { %3706 = vmatprep.subr.bf16.mxu0 %v3705_v3 }
   0x5   :  { %3708 = vmatpush3.bf16.msra.mxu0 %v3705_v3 }
   0x6   :  { %3710 = vmatprep.subr.bf16.mxu0 %v3709_v6 }
   0x7   :  { %16 = vsyncpa [#allocation3], 0  ;;  %v108_v8 = vld [vmem:[%s4772_s0 + $0x8] sm:$0xff]  ;;  %v109_v9 = vld [vmem:[%s4772_s0 + $0x10] sm:$0xff]  ;;  %v128_v30 = vlaneseq  ;;  %vm627_vm2 = vcmask 261120   ;;  %vm3996_vm3 = vmmov 0  }
   0x8   :  { %v110_v10 = vld [vmem:[%s4772_s0 + $0x18] sm:$0xff]  ;;  %v111_v11 = vld [vmem:[%s4772_s0 + $0x20] sm:$0xff]  ;;  %v112_v12 = vld [vmem:[%s4772_s0 + $0x28] sm:$0xff]  ;;  %s3998_s14 = smov 64   ;;  %s4000_s19 = smov 32   ;;  %vm2788_vm4 = vcmask 254976  }
   0x9   :  { %3712 = vmatpush3.bf16.msra.mxu0 %v3709_v6  ;;  %v113_v13 = vld [vmem:[%s4772_s0 + $0x30] sm:$0xff]  ;;  %v114_v14 = vld [vmem:[%s4772_s0 + $0x38] sm:$0xff]  ;;  %v115_v15 = vld [vmem:[%s4772_s0 + $0x40] sm:$0xff]  ;;  %v4152_v31 = vshrl.u32 %v128_v30, 7  ;;  %vm2870_vm5 = vcmask 41984   ;;  %vm2888_vm6 = vcmask 1024  }
   0xa   :  { %3267 = vmatprep.subr.msk.mxu0 %vm181_vm1, %v127_v7  ;;  %v116_v16 = vld [vmem:[%s4772_s0 + $0x48] sm:$0xff]  ;;  %v117_v17 = vld [vmem:[%s4772_s0 + $0x50] sm:$0xff]  ;;  %v118_v18 = vld [vmem:[%s4772_s0 + $0x58] sm:$0xff]  ;;  %s4002_s22 = smov [#allocation2]  }
   0xb   :  { %v119_v19 = vld [vmem:[%s4772_s0 + $0x60] sm:$0xff]  ;;  %v120_v20 = vld [vmem:[%s4772_s0 + $0x68] sm:$0xff]  ;;  %v121_v21 = vld [vmem:[%s4772_s0 + $0x70] sm:$0xff]  ;;  %v130_v32 = vsub.s32 3, %v4152_v31  ;;  %s2898_s23 = sshll.u32 %s4002_s22, 4  ;;  %s2899_s23 = int_to_ptr.vmem [resolvable:$true] %s2898_s23 }
   0xc   :  { %v122_v22 = vld [vmem:[%s4772_s0 + $0x78] sm:$0xff]  ;;  %v346_v23 = vld [vmem:[%s4775_s3] sm:$0xff]  ;;  %v35_v25 = vld [vmem:[%s4776_s4 + $0x8] sm:$0xff]  ;;  %s3971_s24 = scalar_lea.vmem %s2899_s23, 32  ;;  %p3976_p1 = scmp.lt.s32.totalorder %s2899_s23, %s2899_s23 }
   0xd   :  { %3268 = vmatpush3.msk.msra.mxu0 %vm181_vm1, %v127_v7  ;;  %3325 = vmatprep.mubr.f32.mxu1 %v346_v23  ;;  %v34_v24 = vld [vmem:[%s4776_s4] sm:$0xff]  ;;  %v36_v27 = vld [vmem:[%s4776_s4 + $0x10] sm:$0xff]  ;;  %v37_v28 = vld [vmem:[%s4776_s4 + $0x18] sm:$0xff]  ;;  %p3972_p0 = scmp.ne.s32.totalorder %s2899_s23, %s3971_s24  ;;  %p3977_p2 = scmp.lt.s32.totalorder %s3971_s24, %s3971_s24 }
   0xe   :  { %3270 = vmatmul.mubr.msk.f32.vlgmr.msra.gmra.mrb[0].mxu0 %vm132_vm0, %v108_v8  ;;  %v3753_v26 = vpack.c.bf16 %v35_v25, %v34_v24  ;;  %v3757_v29 = vpack.c.bf16 %v37_v28, %v36_v27  ;;  %v4158_v33 = vld [vmem:[%s4779_s7] sm:$0xff]  ;;  %v347_v30 = vld [vmem:[%s4775_s3 + $0x8] sm:$0xff] }
   0xf   :  { %3272 = vmatprep.mubr.msk.f32.mxu0 %vm132_vm0, %v109_v9  ;;  %v4161_v34 = vrot.slane %v4158_v33, %v130_v32  ;;  %v38_v25 = vld [vmem:[%s4776_s4 + $0x20] sm:$0xff]  ;;  %v348_v32 = vld [vmem:[%s4775_s3 + $0x10] sm:$0xff]  ;;  %p3978_p3 = por %p3977_p2, %p3976_p1 }
  0x10   :  { %3754 = vmatprep.subr.bf16.mxu0 %v3753_v26 }
  0x11   :  { %3756 = vmatpush3.bf16.msra.mxu0 %v3753_v26  ;;  %v39_v26 = vld [vmem:[%s4776_s4 + $0x28] sm:$0xff]  ;;  %p3979_p4 = pnand %p3978_p3, %p3972_p0 }
  0x12   :  { %3273 = vmatmul.mubr.msk.f32.gmra.mrb[2].mxu0 %vm132_vm0, %v110_v10  ;;  %3758 = vmatprep.subr.bf16.mxu0 %v3757_v29 }
  0x13   :  { %3275 = vmatprep.mubr.msk.f32.mxu0 %vm132_vm0, %v111_v11 }
  0x15   :  { %3760 = vmatpush3.bf16.msra.mxu0 %v3757_v29  ;;  %v3745_v29 = vpack.c.bf16 %v39_v26, %v38_v25 }
  0x16   :  { %3276 = vmatmul.mubr.msk.f32.gmra.mrb[4].mxu0 %vm132_vm0, %v112_v12 }
  0x17   :  { %3278 = vmatprep.mubr.msk.f32.mxu0 %vm132_vm0, %v113_v13 }
  0x1a   :  { %3279 = vmatmul.mubr.msk.f32.gmra.mrb[6].mxu0 %vm132_vm0, %v114_v14 }
  0x1b   :  { %3281 = vmatprep.mubr.msk.f32.mxu0 %vm132_vm0, %v115_v15 }
  0x1e   :  { %3282 = vmatmul.mubr.msk.f32.gmra.mrb[8].mxu0 %vm132_vm0, %v116_v16 }
  0x1f   :  { %3284 = vmatprep.mubr.msk.f32.mxu0 %vm132_vm0, %v117_v17 }
  0x22   :  { %3285 = vmatmul.mubr.msk.f32.gmra.mrb[10].mxu0 %vm132_vm0, %v118_v18 }
  0x23   :  { %3287 = vmatprep.mubr.msk.f32.mxu0 %vm132_vm0, %v119_v19 }
  0x26   :  { %3288 = vmatmul.mubr.msk.f32.gmra.mrb[12].mxu0 %vm132_vm0, %v120_v20 }
  0x27   :  { %3290 = vmatprep.mubr.msk.f32.mxu0 %vm132_vm0, %v121_v21 }
  0x2a   :  { %3291 = vmatmul.mubr.msk.f32.gmra.mrb[14].mxu0 %vm132_vm0, %v122_v22 }
  0xe1   :  { %v3271_v35 = vpop.f32.mrb[0].mxu0 }
  0xe2   :  { %v257_v36 = vadd.f32 %v3271_v35, %v4161_v34  ;;  %v251_v37 = vpop.f32.mrb[1].mxu0  ;;  %v350_v35 = vld [vmem:[%s4775_s3 + $0x20] sm:$0xff] }
  0xe3   :  { %v252_v38 = vadd.f32 %v251_v37, %v4161_v34  ;;  %v352_v37 = vld [vmem:[%s4775_s3 + $0x30] sm:$0xff] }
  0xe4   :  { %v331_v39 = vmax.f32 %v257_v36, 0.0  ;;  %v351_v36 = vld [vmem:[%s4775_s3 + $0x28] sm:$0xff] }
  0xe5   :  { %v330_v40 = vmax.f32 %v252_v38, 0.0  ;;  %v3274_v41 = vpop.f32.mrb[2].mxu0  ;;  %v353_v38 = vld [vmem:[%s4775_s3 + $0x38] sm:$0xff] }
  0xe6   :  { %v267_v42 = vadd.f32 %v3274_v41, %v4161_v34  ;;  %v261_v43 = vpop.f32.mrb[3].mxu0  ;;  %v356_v41 = vld [vmem:[%s4775_s3 + $0x50] sm:$0xff] }
  0xe7   :  { %v262_v44 = vadd.f32 %v261_v43, %v4161_v34  ;;  %v3713_v45 = vpack.c.bf16 %v331_v39, %v330_v40  ;;  %v354_v39 = vld [vmem:[%s4775_s3 + $0x40] sm:$0xff]  ;;  %v355_v40 = vld [vmem:[%s4775_s3 + $0x48] sm:$0xff] }
  0xe8   :  { %v333_v46 = vmax.f32 %v267_v42, 0.0  ;;  %v357_v42 = vld [vmem:[%s4775_s3 + $0x58] sm:$0xff]  ;;  %v358_v43 = vld [vmem:[%s4775_s3 + $0x60] sm:$0xff] }
  0xe9   :  { %v332_v47 = vmax.f32 %v262_v44, 0.0  ;;  %v3277_v48 = vpop.f32.mrb[4].mxu0  ;;  %3714 = vmatprep.subr.bf16.mxu1 %v3713_v45  ;;  %v359_v44 = vld [vmem:[%s4775_s3 + $0x68] sm:$0xff] }
  0xea   :  { %v277_v49 = vadd.f32 %v3277_v48, %v4161_v34  ;;  %v271_v50 = vpop.f32.mrb[5].mxu0  ;;  %3716 = vmatpush3.bf16.msra.mxu1 %v3713_v45  ;;  %v360_v45 = vld [vmem:[%s4775_s3 + $0x70] sm:$0xff]  ;;  %v363_v48 = vld [vmem:[%s4775_s3 + $0x88] sm:$0xff] }
  0xeb   :  { %v3717_v51 = vpack.c.bf16 %v333_v46, %v332_v47  ;;  %v272_v52 = vadd.f32 %v271_v50, %v4161_v34  ;;  %v361_v46 = vld [vmem:[%s4775_s3 + $0x78] sm:$0xff]  ;;  %v362_v47 = vld [vmem:[%s4775_s3 + $0x80] sm:$0xff] }
  0xec   :  { %v335_v53 = vmax.f32 %v277_v49, 0.0  ;;  %v364_v49 = vld [vmem:[%s4775_s3 + $0x90] sm:$0xff]  ;;  %v365_v50 = vld [vmem:[%s4775_s3 + $0x98] sm:$0xff] }
  0xed   :  { %v334_v54 = vmax.f32 %v272_v52, 0.0  ;;  %v3280_v55 = vpop.f32.mrb[6].mxu0  ;;  %3718 = vmatprep.subr.bf16.mxu1 %v3717_v51  ;;  %v367_v52 = vld [vmem:[%s4775_s3 + $0xa8] sm:$0xff] }
  0xee   :  { %v287_v56 = vadd.f32 %v3280_v55, %v4161_v34  ;;  %v281_v57 = vpop.f32.mrb[7].mxu0  ;;  %3720 = vmatpush3.bf16.msra.mxu1 %v3717_v51  ;;  %v366_v51 = vld [vmem:[%s4775_s3 + $0xa0] sm:$0xff] }
  0xef   :  { %v3721_v58 = vpack.c.bf16 %v335_v53, %v334_v54  ;;  %v282_v59 = vadd.f32 %v281_v57, %v4161_v34  ;;  %v368_v53 = vld [vmem:[%s4775_s3 + $0xb0] sm:$0xff]  ;;  %v369_v54 = vld [vmem:[%s4775_s3 + $0xb8] sm:$0xff]  ;;  %v370_v55 = vld [vmem:[%s4775_s3 + $0xc0] sm:$0xff] }
  0xf0   :  { %v337_v60 = vmax.f32 %v287_v56, 0.0  ;;  %v371_v56 = vld [vmem:[%s4775_s3 + $0xc8] sm:$0xff]  ;;  %v372_v57 = vld [vmem:[%s4775_s3 + $0xd0] sm:$0xff] }
  0xf1   :  { %v336_v61 = vmax.f32 %v282_v59, 0.0  ;;  %v3283_v62 = vpop.f32.mrb[8].mxu0  ;;  %3722 = vmatprep.subr.bf16.mxu1 %v3721_v58  ;;  %v374_v59 = vld [vmem:[%s4775_s3 + $0xe0] sm:$0xff] }
  0xf2   :  { %v297_v63 = vadd.f32 %v3283_v62, %v4161_v34  ;;  %v291_v0 = vpop.f32.mrb[9].mxu0  ;;  %3724 = vmatpush3.bf16.msra.mxu1 %v3721_v58  ;;  %v373_v58 = vld [vmem:[%s4775_s3 + $0xd8] sm:$0xff] }
  0xf3   :  { %v3725_v1 = vpack.c.bf16 %v337_v60, %v336_v61  ;;  %v292_v2 = vadd.f32 %v291_v0, %v4161_v34  ;;  %v375_v60 = vld [vmem:[%s4775_s3 + $0xe8] sm:$0xff]  ;;  %v376_v61 = vld [vmem:[%s4775_s3 + $0xf0] sm:$0xff]  ;;  %v377_v62 = vld [vmem:[%s4775_s3 + $0xf8] sm:$0xff] }
  0xf4   :  { %v339_v3 = vmax.f32 %v297_v63, 0.0  ;;  %v378_v63 = vld [vmem:[%s4775_s3 + $0x100] sm:$0xff]  ;;  %v379_v0 = vld [vmem:[%s4775_s3 + $0x108] sm:$0xff] }
  0xf5   :  { %v338_v4 = vmax.f32 %v292_v2, 0.0  ;;  %v3286_v5 = vpop.f32.mrb[10].mxu0  ;;  %3726 = vmatprep.subr.bf16.mxu1 %v3725_v1  ;;  %v381_v2 = vld [vmem:[%s4775_s3 + $0x118] sm:$0xff] }
  0xf6   :  { %v307_v6 = vadd.f32 %v3286_v5, %v4161_v34  ;;  %v301_v7 = vpop.f32.mrb[11].mxu0  ;;  %3728 = vmatpush3.bf16.msra.mxu1 %v3725_v1  ;;  %v380_v1 = vld [vmem:[%s4775_s3 + $0x110] sm:$0xff] }
  0xf7   :  { %v3729_v8 = vpack.c.bf16 %v339_v3, %v338_v4  ;;  %v302_v9 = vadd.f32 %v301_v7, %v4161_v34  ;;  %v40_v3 = vld [vmem:[%s4776_s4 + $0x30] sm:$0xff]  ;;  %v41_v4 = vld [vmem:[%s4776_s4 + $0x38] sm:$0xff]  ;;  %v43_v7 = vld [vmem:[%s4776_s4 + $0x48] sm:$0xff] }
  0xf8   :  { %v341_v10 = vmax.f32 %v307_v6, 0.0  ;;  %v3749_v5 = vpack.c.bf16 %v41_v4, %v40_v3  ;;  %v42_v6 = vld [vmem:[%s4776_s4 + $0x40] sm:$0xff] }
  0xf9   :  { %v340_v11 = vmax.f32 %v302_v9, 0.0  ;;  %v3289_v12 = vpop.f32.mrb[12].mxu0  ;;  %3730 = vmatprep.subr.bf16.mxu1 %v3729_v8  ;;  %v44_v9 = vld [vmem:[%s4776_s4 + $0x50] sm:$0xff] }
  0xfa   :  { %v317_v13 = vadd.f32 %v3289_v12, %v4161_v34  ;;  %v311_v14 = vpop.f32.mrb[13].mxu0  ;;  %3732 = vmatpush3.bf16.msra.mxu1 %v3729_v8  ;;  %v3761_v8 = vpack.c.bf16 %v43_v7, %v42_v6  ;;  %v66_v6 = vld [vmem:[%s4776_s4 + $0x100] sm:$0xff]  ;;  %v67_v7 = vld [vmem:[%s4776_s4 + $0x108] sm:$0xff] }
  0xfb   :  { %v3733_v15 = vpack.c.bf16 %v341_v10, %v340_v11  ;;  %v312_v16 = vadd.f32 %v311_v14, %v4161_v34  ;;  %v45_v10 = vld [vmem:[%s4776_s4 + $0x58] sm:$0xff]  ;;  %v46_v14 = vld [vmem:[%s4776_s4 + $0x60] sm:$0xff] }
  0xfc   :  { %v343_v17 = vmax.f32 %v317_v13, 0.0  ;;  %3762 = vmatprep.subr.bf16.mxu0 %v3761_v8  ;;  %v3765_v13 = vpack.c.bf16 %v45_v10, %v44_v9  ;;  %v3809_v10 = vpack.c.bf16 %v67_v7, %v66_v6  ;;  %v2912_v6 = vld [vmem:[%s4776_s4 + $0x120] sm:$0xff]  ;;  %v2913_v7 = vld [vmem:[%s4776_s4 + $0x128] sm:$0xff] }
  0xfd   :  { %v342_v18 = vmax.f32 %v312_v16, 0.0  ;;  %v3292_v19 = vpop.f32.mrb[14].mxu0  ;;  %3734 = vmatprep.subr.bf16.mxu1 %v3733_v15 }
  0xfe   :  { %v327_v20 = vadd.f32 %v3292_v19, %v4161_v34  ;;  %v321_v21 = vpop.f32.mrb[15].mxu0  ;;  %3736 = vmatpush3.bf16.msra.mxu1 %v3733_v15  ;;  %v47_v15 = vld [vmem:[%s4776_s4 + $0x68] sm:$0xff] }
  0xff   :  { %v3737_v22 = vpack.c.bf16 %v343_v17, %v342_v18  ;;  %v322_v23 = vadd.f32 %v321_v21, %v4161_v34  ;;  %v349_v34 = vld [vmem:[%s4775_s3 + $0x18] sm:$0xff]  ;;  %v3769_v18 = vpack.c.bf16 %v47_v15, %v46_v14 }
 0x100   :  { %v345_v24 = vmax.f32 %v327_v20, 0.0 }
 0x101   :  { %v344_v27 = vmax.f32 %v322_v23, 0.0  ;;  %3738 = vmatprep.subr.bf16.mxu1 %v3737_v22  ;;  %v48_v23 = vld [vmem:[%s4776_s4 + $0x70] sm:$0xff] }
 0x102   :  { %3740 = vmatpush3.bf16.msra.mxu1 %v3737_v22 }
 0x103   :  { %v3741_v28 = vpack.c.bf16 %v345_v24, %v344_v27  ;;  %v49_v24 = vld [vmem:[%s4776_s4 + $0x78] sm:$0xff] }
 0x104   :  { %v3773_v27 = vpack.c.bf16 %v49_v24, %v48_v23  ;;  %v3997_v23 = vmov 0.0   ;;  %v2916_v24 = vld [vmem:[%s4776_s4 + $0x140] sm:$0xff] }
 0x105   :  { %3742 = vmatprep.subr.bf16.mxu1 %v3741_v28 }
 0x106   :  { %3744 = vmatpush3.bf16.msra.mxu1 %v3741_v28  ;;  %v50_v28 = vld [vmem:[%s4776_s4 + $0x80] sm:$0xff] }
 0x107   :  { %3746 = vmatprep.subr.bf16.mxu1 %v3745_v29 }
 0x109   :  { %3326 = vmatmul.mubr.f32.vlgmr.msra.gmra.mrb[0].mxu1 %v347_v30 }
 0x10a   :  { %3328 = vmatprep.mubr.f32.mxu1 %v348_v32  ;;  %3748 = vmatpush3.bf16.msra.mxu1 %v3745_v29  ;;  %v51_v29 = vld [vmem:[%s4776_s4 + $0x88] sm:$0xff] }
 0x10b   :  { %3750 = vmatprep.subr.bf16.mxu1 %v3749_v5 }
 0x10d   :  { %3329 = vmatmul.mubr.f32.gmra.mrb[2].mxu1 %v349_v34  ;;  %v3777_v34 = vpack.c.bf16 %v51_v29, %v50_v28 }
 0x10e   :  { %3331 = vmatprep.mubr.f32.mxu1 %v350_v35  ;;  %3752 = vmatpush3.bf16.msra.mxu1 %v3749_v5  ;;  %v52_v35 = vld [vmem:[%s4776_s4 + $0x90] sm:$0xff] }
 0x111   :  { %3332 = vmatmul.mubr.f32.gmra.mrb[4].mxu1 %v351_v36  ;;  %v53_v36 = vld [vmem:[%s4776_s4 + $0x98] sm:$0xff] }
 0x112   :  { %3334 = vmatprep.mubr.f32.mxu1 %v352_v37 }
 0x115   :  { %3335 = vmatmul.mubr.f32.gmra.mrb[6].mxu1 %v353_v38 }
 0x116   :  { %3337 = vmatprep.mubr.f32.mxu1 %v354_v39  ;;  %v3781_v39 = vpack.c.bf16 %v53_v36, %v52_v35 }
 0x119   :  { %3338 = vmatmul.mubr.f32.gmra.mrb[8].mxu1 %v355_v40  ;;  %v54_v40 = vld [vmem:[%s4776_s4 + $0xa0] sm:$0xff] }
 0x11a   :  { %3340 = vmatprep.mubr.f32.mxu1 %v356_v41  ;;  %v55_v41 = vld [vmem:[%s4776_s4 + $0xa8] sm:$0xff] }
 0x11d   :  { %3341 = vmatmul.mubr.f32.gmra.mrb[10].mxu1 %v357_v42 }
 0x11e   :  { %3343 = vmatprep.mubr.f32.mxu1 %v358_v43 }
 0x121   :  { %3344 = vmatmul.mubr.f32.gmra.mrb[12].mxu1 %v359_v44  ;;  %v3785_v44 = vpack.c.bf16 %v55_v41, %v54_v40 }
 0x122   :  { %3346 = vmatprep.mubr.f32.mxu1 %v360_v45  ;;  %v56_v45 = vld [vmem:[%s4776_s4 + $0xb0] sm:$0xff] }
 0x125   :  { %3347 = vmatmul.mubr.f32.gmra.mrb[14].mxu1 %v361_v46  ;;  %v57_v46 = vld [vmem:[%s4776_s4 + $0xb8] sm:$0xff] }
 0x126   :  { %3349 = vmatprep.mubr.f32.mxu1 %v362_v47 }
 0x129   :  { %3350 = vmatmul.mubr.f32.gmra.mrb[16].mxu1 %v363_v48 }
 0x12a   :  { %3352 = vmatprep.mubr.f32.mxu1 %v364_v49  ;;  %v3789_v49 = vpack.c.bf16 %v57_v46, %v56_v45 }
 0x12d   :  { %3353 = vmatmul.mubr.f32.gmra.mrb[18].mxu1 %v365_v50  ;;  %v58_v50 = vld [vmem:[%s4776_s4 + $0xc0] sm:$0xff] }
 0x12e   :  { %3355 = vmatprep.mubr.f32.mxu1 %v366_v51  ;;  %v59_v51 = vld [vmem:[%s4776_s4 + $0xc8] sm:$0xff] }
 0x131   :  { %3356 = vmatmul.mubr.f32.gmra.mrb[20].mxu1 %v367_v52 }
 0x132   :  { %3358 = vmatprep.mubr.f32.mxu1 %v368_v53 }
 0x135   :  { %3359 = vmatmul.mubr.f32.gmra.mrb[22].mxu1 %v369_v54  ;;  %v3793_v54 = vpack.c.bf16 %v59_v51, %v58_v50 }
 0x136   :  { %3361 = vmatprep.mubr.f32.mxu1 %v370_v55  ;;  %v60_v55 = vld [vmem:[%s4776_s4 + $0xd0] sm:$0xff] }
 0x139   :  { %3362 = vmatmul.mubr.f32.gmra.mrb[24].mxu1 %v371_v56  ;;  %v61_v56 = vld [vmem:[%s4776_s4 + $0xd8] sm:$0xff] }
 0x13a   :  { %3364 = vmatprep.mubr.f32.mxu1 %v372_v57 }
 0x13d   :  { %3365 = vmatmul.mubr.f32.gmra.mrb[26].mxu1 %v373_v58 }
 0x13e   :  { %3367 = vmatprep.mubr.f32.mxu1 %v374_v59  ;;  %v3797_v59 = vpack.c.bf16 %v61_v56, %v60_v55  ;;  %v1542_v56 = vld [vmem:[%s4777_s5 + $0x8] sm:$0xff] }
 0x141   :  { %3368 = vmatmul.mubr.f32.gmra.mrb[28].mxu1 %v375_v60  ;;  %v62_v60 = vld [vmem:[%s4776_s4 + $0xe0] sm:$0xff] }
 0x142   :  { %3370 = vmatprep.mubr.f32.mxu1 %v376_v61  ;;  %v63_v61 = vld [vmem:[%s4776_s4 + $0xe8] sm:$0xff] }
 0x145   :  { %3371 = vmatmul.mubr.f32.gmra.mrb[30].mxu1 %v377_v62 }
 0x146   :  { %3373 = vmatprep.mubr.f32.mxu1 %v378_v63 }
 0x149   :  { %3374 = vmatmul.mubr.f32.gmra.mrb[32].mxu1 %v379_v0  ;;  %v3801_v0 = vpack.c.bf16 %v63_v61, %v62_v60  ;;  %v1546_v60 = vld [vmem:[%s4777_s5 + $0x28] sm:$0xff]  ;;  %v1547_v61 = vld [vmem:[%s4777_s5 + $0x30] sm:$0xff] }
 0x14a   :  { %3376 = vmatprep.mubr.f32.mxu1 %v380_v1  ;;  %v64_v1 = vld [vmem:[%s4776_s4 + $0xf0] sm:$0xff] }
 0x14d   :  { %3377 = vmatmul.mubr.f32.gmra.mrb[34].mxu1 %v381_v2  ;;  %v65_v2 = vld [vmem:[%s4776_s4 + $0xf8] sm:$0xff] }
 0x14e   :  { %v3805_v5 = vpack.c.bf16 %v65_v2, %v64_v1  ;;  %v2919_v1 = vld [vmem:[%s4776_s4 + $0x158] sm:$0xff] }
 0x1dc   :  { %v3327_v11 = vpop.f32.mrb[0].mxu1 }
 0x1dd   :  { %v448_v12 = vpop.f32.mrb[1].mxu1 }
 0x1de   :  { %3401 = vmatprep.mubr.msk.f32.mxu0 %vm627_vm2, %v448_v12  ;;  %v69_v12 = vld [vmem:[%s4776_s4 + $0x118] sm:$0xff] }
 0x1df   :  { %3402 = vmatmul.mubr.msk.f32.vlgmr.msra.gmra.mrb[16].mxu0 %vm627_vm2, %v3327_v11  ;;  %v68_v11 = vld [vmem:[%s4776_s4 + $0x110] sm:$0xff] }
 0x1e0   :  { %v3330_v16 = vpop.f32.mrb[2].mxu1  ;;  %3764 = vmatpush3.bf16.msra.mxu0 %v3761_v8  ;;  %v3813_v15 = vpack.c.bf16 %v69_v12, %v68_v11  ;;  %v2914_v11 = vld [vmem:[%s4776_s4 + $0x130] sm:$0xff]  ;;  %v2915_v12 = vld [vmem:[%s4776_s4 + $0x138] sm:$0xff] }
 0x1e1   :  { %v458_v17 = vpop.f32.mrb[3].mxu1  ;;  %3766 = vmatprep.subr.bf16.mxu0 %v3765_v13 }
 0x1e2   :  { %3404 = vmatprep.mubr.msk.f32.mxu0 %vm627_vm2, %v458_v17 }
 0x1e3   :  { %3405 = vmatmul.mubr.msk.f32.gmra.mrb[18].mxu0 %vm627_vm2, %v3330_v16 }
 0x1e4   :  { %v3333_v19 = vpop.f32.mrb[4].mxu1  ;;  %3768 = vmatpush3.bf16.msra.mxu0 %v3765_v13 }
 0x1e5   :  { %v468_v20 = vpop.f32.mrb[5].mxu1  ;;  %3770 = vmatprep.subr.bf16.mxu0 %v3769_v18 }
 0x1e6   :  { %3387 = vmatprep.mubr.msk.f32.mxu1 %vm627_vm2, %v468_v20 }
 0x1e7   :  { %3388 = vmatmul.mubr.msk.f32.vlgmr.msra.gmra.mrb[36].mxu1 %vm627_vm2, %v3333_v19 }
 0x1e8   :  { %v3336_v21 = vpop.f32.mrb[6].mxu1 }
 0x1e9   :  { %v478_v22 = vpop.f32.mrb[7].mxu1 }
 0x1ea   :  { %3390 = vmatprep.mubr.msk.f32.mxu1 %vm627_vm2, %v478_v22  ;;  %v3995_v22 = vmov 0.0|0.0  }
 0x1eb   :  { %3391 = vmatmul.mubr.msk.f32.gmra.mrb[38].mxu1 %vm627_vm2, %v3336_v21  ;;  %3817 = vmatprep.subr.bf16.mxu1 %v3995_v22 }
 0x1ec   :  { %v3339_v25 = vpop.f32.mrb[8].mxu1  ;;  %3513 = vmatprep.mubr.msk.f32.mxu1 %vm3996_vm3, %v3997_v23 }
 0x1ed   :  { %v488_v26 = vpop.f32.mrb[9].mxu1 }
 0x1ee   :  { %3415 = vmatprep.mubr.msk.f32.mxu0 %vm627_vm2, %v488_v26 }
 0x1ef   :  { %3416 = vmatmul.mubr.msk.f32.vlgmr.msra.gmra.mrb[16].mxu0 %vm627_vm2, %v3339_v25  ;;  %v2917_v25 = vld [vmem:[%s4776_s4 + $0x148] sm:$0xff] }
 0x1f0   :  { %v3342_v30 = vpop.f32.mrb[10].mxu1  ;;  %3772 = vmatpush3.bf16.msra.mxu0 %v3769_v18  ;;  %v3824_v26 = vpack.c.bf16 %v2917_v25, %v2916_v24  ;;  %v2923_v24 = vld [vmem:[%s4776_s4 + $0x178] sm:$0xff]  ;;  %v2936_v25 = vld [vmem:[%s4776_s4 + $0x1e0] sm:$0xff] }
 0x1f1   :  { %v498_v32 = vpop.f32.mrb[11].mxu1  ;;  %3774 = vmatprep.subr.bf16.mxu0 %v3773_v27 }
 0x1f2   :  { %3418 = vmatprep.mubr.msk.f32.mxu0 %vm627_vm2, %v498_v32  ;;  %v1531_v32 = vsub.s32 4, %v4152_v31 }
 0x1f3   :  { %3419 = vmatmul.mubr.msk.f32.gmra.mrb[18].mxu0 %vm627_vm2, %v3342_v30 }
 0x1f4   :  { %v3345_v37 = vpop.f32.mrb[12].mxu1  ;;  %3776 = vmatpush3.bf16.msra.mxu0 %v3773_v27 }
 0x1f5   :  { %v508_v38 = vpop.f32.mrb[13].mxu1  ;;  %3778 = vmatprep.subr.bf16.mxu0 %v3777_v34 }
 0x1f6   :  { %3429 = vmatprep.mubr.msk.f32.mxu0 %vm627_vm2, %v508_v38 }
 0x1f7   :  { %3430 = vmatmul.mubr.msk.f32.vlgmr.msra.gmra.mrb[16].mxu0 %vm627_vm2, %v3345_v37 }
 0x1f8   :  { %v3348_v42 = vpop.f32.mrb[14].mxu1  ;;  %3780 = vmatpush3.bf16.msra.mxu0 %v3777_v34  ;;  %v1532_v34 = vrot.slane %v4158_v33, %v1531_v32  ;;  %v2928_v33 = vld [vmem:[%s4776_s4 + $0x1a0] sm:$0xff] }
 0x1f9   :  { %v518_v43 = vpop.f32.mrb[15].mxu1  ;;  %3782 = vmatprep.subr.bf16.mxu0 %v3781_v39  ;;  %v2924_v32 = vld [vmem:[%s4776_s4 + $0x180] sm:$0xff] }
 0x1fa   :  { %3432 = vmatprep.mubr.msk.f32.mxu0 %vm627_vm2, %v518_v43 }
 0x1fb   :  { %3433 = vmatmul.mubr.msk.f32.gmra.mrb[18].mxu0 %vm627_vm2, %v3348_v42 }
 0x1fc   :  { %v3351_v47 = vpop.f32.mrb[16].mxu1  ;;  %3784 = vmatpush3.bf16.msra.mxu0 %v3781_v39 }
 0x1fd   :  { %v528_v48 = vpop.f32.mrb[17].mxu1  ;;  %3786 = vmatprep.subr.bf16.mxu0 %v3785_v44 }
 0x1fe   :  { %3443 = vmatprep.mubr.msk.f32.mxu0 %vm627_vm2, %v528_v48 }
 0x1ff   :  { %3444 = vmatmul.mubr.msk.f32.vlgmr.msra.gmra.mrb[16].mxu0 %vm627_vm2, %v3351_v47 }
 0x200   :  { %v3354_v52 = vpop.f32.mrb[18].mxu1  ;;  %3788 = vmatpush3.bf16.msra.mxu0 %v3785_v44 }
 0x201   :  { %v538_v53 = vpop.f32.mrb[19].mxu1  ;;  %3790 = vmatprep.subr.bf16.mxu0 %v3789_v49 }
 0x202   :  { %3446 = vmatprep.mubr.msk.f32.mxu0 %vm627_vm2, %v538_v53 }
 0x203   :  { %3447 = vmatmul.mubr.msk.f32.gmra.mrb[18].mxu0 %vm627_vm2, %v3354_v52  ;;  %v2929_v52 = vld [vmem:[%s4776_s4 + $0x1a8] sm:$0xff] }
 0x204   :  { %v3357_v57 = vpop.f32.mrb[20].mxu1  ;;  %3792 = vmatpush3.bf16.msra.mxu0 %v3789_v49  ;;  %v3848_v55 = vpack.c.bf16 %v2929_v52, %v2928_v33  ;;  %v2946_v33 = vld [vmem:[%s4776_s4 + $0x230] sm:$0xff]  ;;  %v2947_v52 = vld [vmem:[%s4776_s4 + $0x238] sm:$0xff] }
 0x205   :  { %v548_v58 = vpop.f32.mrb[21].mxu1  ;;  %3794 = vmatprep.subr.bf16.mxu0 %v3793_v54 }
 0x206   :  { %3457 = vmatprep.mubr.msk.f32.mxu0 %vm627_vm2, %v548_v58  ;;  %v1544_v58 = vld [vmem:[%s4777_s5 + $0x18] sm:$0xff] }
 0x207   :  { %3458 = vmatmul.mubr.msk.f32.vlgmr.msra.gmra.mrb[16].mxu0 %vm627_vm2, %v3357_v57  ;;  %v1543_v57 = vld [vmem:[%s4777_s5 + $0x10] sm:$0xff] }
 0x208   :  { %v3360_v62 = vpop.f32.mrb[22].mxu1  ;;  %3796 = vmatpush3.bf16.msra.mxu0 %v3793_v54  ;;  %v1541_v54 = vld [vmem:[%s4777_s5] sm:$0xff] }
 0x209   :  { %v558_v63 = vpop.f32.mrb[23].mxu1  ;;  %3798 = vmatprep.subr.bf16.mxu0 %v3797_v59 }
 0x20a   :  { %3460 = vmatprep.mubr.msk.f32.mxu0 %vm627_vm2, %v558_v63  ;;  %v1549_v63 = vld [vmem:[%s4777_s5 + $0x40] sm:$0xff] }
 0x20b   :  { %3461 = vmatmul.mubr.msk.f32.gmra.mrb[18].mxu0 %vm627_vm2, %v3360_v62  ;;  %v1548_v62 = vld [vmem:[%s4777_s5 + $0x38] sm:$0xff] }
 0x20c   :  { %v3363_v3 = vpop.f32.mrb[24].mxu1  ;;  %3800 = vmatpush3.bf16.msra.mxu0 %v3797_v59  ;;  %v1545_v59 = vld [vmem:[%s4777_s5 + $0x20] sm:$0xff] }
 0x20d   :  { %v568_v4 = vpop.f32.mrb[25].mxu1  ;;  %3802 = vmatprep.subr.bf16.mxu0 %v3801_v0 }
 0x20e   :  { %3471 = vmatprep.mubr.msk.f32.mxu0 %vm627_vm2, %v568_v4  ;;  %v2931_v4 = vld [vmem:[%s4776_s4 + $0x1b8] sm:$0xff] }
 0x20f   :  { %3472 = vmatmul.mubr.msk.f32.vlgmr.msra.gmra.mrb[16].mxu0 %vm627_vm2, %v3363_v3  ;;  %v2930_v3 = vld [vmem:[%s4776_s4 + $0x1b0] sm:$0xff] }
 0x210   :  { %v3366_v8 = vpop.f32.mrb[26].mxu1  ;;  %3804 = vmatpush3.bf16.msra.mxu0 %v3801_v0  ;;  %v2918_v0 = vld [vmem:[%s4776_s4 + $0x150] sm:$0xff] }
 0x211   :  { %v578_v9 = vpop.f32.mrb[27].mxu1  ;;  %3806 = vmatprep.subr.bf16.mxu0 %v3805_v5  ;;  %v3827_v2 = vpack.c.bf16 %v2919_v1, %v2918_v0  ;;  %v2941_v0 = vld [vmem:[%s4776_s4 + $0x208] sm:$0xff] }
 0x212   :  { %3474 = vmatprep.mubr.msk.f32.mxu0 %vm627_vm2, %v578_v9 }
 0x213   :  { %3475 = vmatmul.mubr.msk.f32.gmra.mrb[18].mxu0 %vm627_vm2, %v3366_v8 }
 0x214   :  { %v3369_v13 = vpop.f32.mrb[28].mxu1  ;;  %3808 = vmatpush3.bf16.msra.mxu0 %v3805_v5  ;;  %v3851_v5 = vpack.c.bf16 %v2931_v4, %v2930_v3  ;;  %v2676_v3 = vld [vmem:[%s4778_s6 + $0x90] sm:$0xff]  ;;  %v2677_v4 = vld [vmem:[%s4778_s6 + $0x98] sm:$0xff] }
 0x215   :  { %v588_v14 = vpop.f32.mrb[29].mxu1  ;;  %3810 = vmatprep.subr.bf16.mxu0 %v3809_v10 }
 0x216   :  { %3485 = vmatprep.mubr.msk.f32.mxu0 %vm627_vm2, %v588_v14 }
 0x217   :  { %3486 = vmatmul.mubr.msk.f32.vlgmr.msra.gmra.mrb[16].mxu0 %vm627_vm2, %v3369_v13 }
 0x218   :  { %v3372_v16 = vpop.f32.mrb[30].mxu1  ;;  %3812 = vmatpush3.bf16.msra.mxu0 %v3809_v10  ;;  %v3830_v10 = vpack.c.bf16 %v2913_v7, %v2912_v6  ;;  %v2942_v7 = vld [vmem:[%s4776_s4 + $0x210] sm:$0xff] }
 0x219   :  { %v598_v17 = vpop.f32.mrb[31].mxu1  ;;  %3814 = vmatprep.subr.bf16.mxu0 %v3813_v15 }
 0x21a   :  { %3488 = vmatprep.mubr.msk.f32.mxu0 %vm627_vm2, %v598_v17  ;;  %v2921_v17 = vld [vmem:[%s4776_s4 + $0x168] sm:$0xff] }
 0x21b   :  { %3489 = vmatmul.mubr.msk.f32.gmra.mrb[18].mxu0 %vm627_vm2, %v3372_v16  ;;  %v2920_v16 = vld [vmem:[%s4776_s4 + $0x160] sm:$0xff] }
 0x21c   :  { %v3375_v18 = vpop.f32.mrb[32].mxu1  ;;  %3816 = vmatpush3.bf16.msra.mxu0 %v3813_v15  ;;  %v3833_v15 = vpack.c.bf16 %v2915_v12, %v2914_v11  ;;  %v4645_v11 = vld [vmem:[%s4773_s1] sm:$0x3] }
 0x21d   :  { %v608_v19 = vpop.f32.mrb[33].mxu1  ;;  %3823 = vmatprep.subr.bf16.mxu0 %v3995_v22  ;;  %v2357_v12 = vld [vmem:[%s4778_s6] sm:$0xff] }
 0x21e   :  { %3499 = vmatprep.mubr.msk.f32.mxu0 %vm627_vm2, %v608_v19 }
 0x21f   :  { %3500 = vmatmul.mubr.msk.f32.vlgmr.msra.gmra.mrb[16].mxu0 %vm627_vm2, %v3375_v18 }
 0x220   :  { %v3378_v20 = vpop.f32.mrb[34].mxu1  ;;  %3825 = vmatpush3.bf16.msra.mxu0 %v3824_v26  ;;  %v2937_v26 = vld [vmem:[%s4776_s4 + $0x1e8] sm:$0xff] }
 0x221   :  { %v618_v21 = vpop.f32.mrb[35].mxu1  ;;  %3826 = vmatprep.subr.bf16.mxu0 %v3995_v22 }
 0x222   :  { %3502 = vmatprep.mubr.msk.f32.mxu0 %vm627_vm2, %v618_v21  ;;  %v2922_v21 = vld [vmem:[%s4776_s4 + $0x170] sm:$0xff] }
 0x223   :  { %3503 = vmatmul.mubr.msk.f32.gmra.mrb[18].mxu0 %vm627_vm2, %v3378_v20  ;;  %v3836_v20 = vpack.c.bf16 %v2921_v17, %v2920_v16  ;;  %v2360_v16 = vld [vmem:[%s4778_s6 + $0x18] sm:$0xff] }
 0x224   :  { %3548 = vmatprep.mubr.msk.f32.mxu0 %vm3996_vm3, %v3997_v23  ;;  %3828 = vmatpush3.bf16.msra.mxu0 %v3827_v2 }
 0x225   :  { %3829 = vmatprep.subr.bf16.mxu0 %v3995_v22 }
 0x2ba   :  { %v3389_v27 = vpop.f32.mrb[36].mxu1 }
 0x2bb   :  { %v706_v28 = vpop.f32.mrb[37].mxu1 }
 0x2be   :  { %v3392_v29 = vpop.f32.mrb[38].mxu1 }
 0x2bf   :  { %v716_v30 = vpop.f32.mrb[39].mxu1 }
 0x2f2   :  { %v3501_v35 = vpop.f32.mrb[16].mxu0 }
 0x2f3   :  { %v3913_v36 = vadd.f32 %v3501_v35, %v3389_v27  ;;  %v1506_v37 = vpop.f32.mrb[17].mxu0 }
 0x2f4   :  { %v3914_v38 = vadd.f32 %v1506_v37, %v706_v28  ;;  %v2939_v37 = vld [vmem:[%s4776_s4 + $0x1f8] sm:$0xff] }
 0x2f5   :  { %v1534_v39 = vadd.f32 %v3913_v36, %v1532_v34  ;;  %v2938_v36 = vld [vmem:[%s4776_s4 + $0x1f0] sm:$0xff] }
 0x2f6   :  { %v1533_v40 = vadd.f32 %v3914_v38, %v1532_v34  ;;  %v3504_v41 = vpop.f32.mrb[18].mxu0 }
 0x2f7   :  { %v1538_v42 = vmax.f32 %v1534_v39, 0.0  ;;  %v3915_v43 = vadd.f32 %v3504_v41, %v3392_v29  ;;  %v1516_v44 = vpop.f32.mrb[19].mxu0  ;;  %v3839_v29 = vpack.c.bf16 %v2923_v24, %v2922_v21  ;;  %v2927_v41 = vld [vmem:[%s4776_s4 + $0x198] sm:$0xff] }
 0x2f8   :  { %v1537_v45 = vmax.f32 %v1533_v40, 0.0  ;;  %v3916_v46 = vadd.f32 %v1516_v44, %v716_v30  ;;  %v3860_v30 = vpack.c.bf16 %v2937_v26, %v2936_v25  ;;  %v2926_v40 = vld [vmem:[%s4776_s4 + $0x190] sm:$0xff]  ;;  %v2944_v44 = vld [vmem:[%s4776_s4 + $0x220] sm:$0xff] }
 0x2f9   :  { %v1536_v47 = vadd.f32 %v3915_v43, %v1532_v34 }
 0x2fa   :  { %v3818_v48 = vpack.c.bf16 %v1538_v42, %v1537_v45  ;;  %v1535_v49 = vadd.f32 %v3916_v46, %v1532_v34  ;;  %v2925_v34 = vld [vmem:[%s4776_s4 + $0x188] sm:$0xff]  ;;  %v3863_v42 = vpack.c.bf16 %v2939_v37, %v2938_v36 }
 0x2fb   :  { %v1540_v50 = vmax.f32 %v1536_v47, 0.0  ;;  %v3842_v39 = vpack.c.bf16 %v2925_v34, %v2924_v32  ;;  %v2945_v45 = vld [vmem:[%s4776_s4 + $0x228] sm:$0xff]  ;;  %v3845_v47 = vpack.c.bf16 %v2927_v41, %v2926_v40  ;;  %v2680_v40 = vsub.s32 1, %v4152_v31 }
 0x2fc   :  { %v1539_v51 = vmax.f32 %v1535_v49, 0.0  ;;  %3819 = vmatpush3.bf16.msra.mxu1 %v3818_v48  ;;  %v2932_v48 = vld [vmem:[%s4776_s4 + $0x1c0] sm:$0xff]  ;;  %v2933_v49 = vld [vmem:[%s4776_s4 + $0x1c8] sm:$0xff] }
 0x2fd   :  { %3820 = vmatprep.subr.bf16.mxu1 %v3995_v22 }
 0x2fe   :  { %v3821_v53 = vpack.c.bf16 %v1540_v50, %v1539_v51  ;;  %v3872_v50 = vpack.c.bf16 %v2945_v45, %v2944_v44  ;;  %v4674_v44 = vld [vmem:[%s4779_s7] sm:$0xff] }
 0x2ff   :  { %v2681_v45 = vrot.slane %v4674_v44, %v2680_v40 }
 0x300   :  { %3822 = vmatpush3.bf16.msra.mxu1 %v3821_v53 }
 0x301   :  { %3847 = vmatprep.subr.bf16.mxu1 %v3995_v22 }
 0x303   :  { %3514 = vmatmul.mubr.msk.f32.vlgmr.msra.gmra.mrb[40].mxu1 %vm627_vm2, %v1541_v54  ;;  %v3854_v54 = vpack.c.bf16 %v2933_v49, %v2932_v48 }
 0x304   :  { %3516 = vmatprep.mubr.msk.f32.mxu1 %vm3996_vm3, %v3997_v23  ;;  %3849 = vmatpush3.bf16.msra.mxu1 %v3848_v55  ;;  %v2934_v55 = vld [vmem:[%s4776_s4 + $0x1d0] sm:$0xff] }
 0x305   :  { %3850 = vmatprep.subr.bf16.mxu1 %v3995_v22 }
 0x307   :  { %3517 = vmatmul.mubr.msk.f32.gmra.mrb[42].mxu1 %vm627_vm2, %v1542_v56  ;;  %v2935_v56 = vld [vmem:[%s4776_s4 + $0x1d8] sm:$0xff] }
 0x308   :  { %3519 = vmatprep.mubr.msk.f32.mxu1 %vm3996_vm3, %v3997_v23  ;;  %3852 = vmatpush3.bf16.msra.mxu1 %v3851_v5 }
 0x309   :  { %3859 = vmatprep.subr.bf16.mxu1 %v3995_v22 }
 0x30b   :  { %3520 = vmatmul.mubr.msk.f32.gmra.mrb[44].mxu1 %vm627_vm2, %v1543_v57  ;;  %v3875_v57 = vpack.c.bf16 %v2947_v52, %v2946_v33 }
 0x30c   :  { %3522 = vmatprep.mubr.msk.f32.mxu1 %vm3996_vm3, %v3997_v23 }
 0x30f   :  { %3523 = vmatmul.mubr.msk.f32.gmra.mrb[46].mxu1 %vm627_vm2, %v1544_v58 }
 0x310   :  { %3525 = vmatprep.mubr.msk.f32.mxu1 %vm3996_vm3, %v3997_v23 }
 0x313   :  { %3526 = vmatmul.mubr.msk.f32.gmra.mrb[48].mxu1 %vm627_vm2, %v1545_v59  ;;  %v2674_v59 = vld [vmem:[%s4778_s6 + $0x80] sm:$0xff] }
 0x314   :  { %3528 = vmatprep.mubr.msk.f32.mxu1 %vm3996_vm3, %v3997_v23 }
 0x317   :  { %3529 = vmatmul.mubr.msk.f32.gmra.mrb[50].mxu1 %vm627_vm2, %v1546_v60  ;;  %v2675_v60 = vld [vmem:[%s4778_s6 + $0x88] sm:$0xff] }
 0x318   :  { %3531 = vmatprep.mubr.msk.f32.mxu1 %vm3996_vm3, %v3997_v23  ;;  %v3902_v1 = vpack.c.bf16 %v2675_v60, %v2674_v59  ;;  %v2441_v60 = vld [vmem:[%s4778_s6 + $0x30] sm:$0xff] }
 0x31b   :  { %3532 = vmatmul.mubr.msk.f32.gmra.mrb[52].mxu1 %vm627_vm2, %v1547_v61 }
 0x31c   :  { %3534 = vmatprep.mubr.msk.f32.mxu1 %vm3996_vm3, %v3997_v23 }
 0x31f   :  { %3535 = vmatmul.mubr.msk.f32.gmra.mrb[54].mxu1 %vm627_vm2, %v1548_v62  ;;  %v3857_v62 = vpack.c.bf16 %v2935_v56, %v2934_v55  ;;  %v2439_v55 = vld [vmem:[%s4778_s6 + $0x20] sm:$0xff]  ;;  %v2440_v56 = vld [vmem:[%s4778_s6 + $0x28] sm:$0xff] }
 0x320   :  { %3537 = vmatprep.mubr.msk.f32.mxu1 %vm3996_vm3, %v3997_v23 }
 0x323   :  { %3538 = vmatmul.mubr.msk.f32.gmra.mrb[56].mxu1 %vm627_vm2, %v1549_v63  ;;  %v2940_v63 = vld [vmem:[%s4776_s4 + $0x200] sm:$0xff] }
 0x324   :  { %3592 = vmatprep.mubr.msk.f32.mxu1 %vm3996_vm3, %v3997_v23  ;;  %v3866_v6 = vpack.c.bf16 %v2941_v0, %v2940_v63  ;;  %v2517_v63 = vld [vmem:[%s4778_s6 + $0x40] sm:$0xff]  ;;  %v2518_v0 = vld [vmem:[%s4778_s6 + $0x48] sm:$0xff] }
 0x3d6   :  { %v1643_v8 = vpop.f32.mrb[40].mxu1 }
 0x3d7   :  { %v3515_v9 = vpop.f32.mrb[41].mxu1 }
 0x3d8   :  { %v3905_v9 = vpack.c.bf16 %v2677_v4, %v2676_v3  ;;  %v2519_v3 = vld [vmem:[%s4778_s6 + $0x50] sm:$0xff]  ;;  %v2520_v4 = vld [vmem:[%s4778_s6 + $0x58] sm:$0xff] }
 0x3da   :  { %v1648_v13 = vpop.f32.mrb[42].mxu1 }
 0x3db   :  { %v3518_v14 = vpop.f32.mrb[43].mxu1  ;;  %3549 = vmatmul.mubr.msk.f32.vlgmr.msra.gmra.mrb[20].mxu0 %vm627_vm2, %v1648_v13  ;;  %v2358_v13 = vld [vmem:[%s4778_s6 + $0x8] sm:$0xff] }
 0x3dc   :  { %3831 = vmatpush3.bf16.msra.mxu0 %v3830_v10  ;;  %3559 = vmatprep.mubr.msk.f32.mxu0 %vm3996_vm3, %v3997_v23  ;;  %v3878_v14 = vpack.c.bf16 %v2358_v13, %v2357_v12  ;;  %v2598_v12 = vld [vmem:[%s4778_s6 + $0x78] sm:$0xff] }
 0x3dd   :  { %3832 = vmatprep.subr.bf16.mxu0 %v3995_v22 }
 0x3de   :  { %v1653_v18 = vpop.f32.mrb[44].mxu1 }
 0x3df   :  { %v3521_v19 = vpop.f32.mrb[45].mxu1 }
 0x3e0   :  { %3834 = vmatpush3.bf16.msra.mxu0 %v3833_v15  ;;  %v2359_v15 = vld [vmem:[%s4778_s6 + $0x10] sm:$0xff] }
 0x3e1   :  { %3835 = vmatprep.subr.bf16.mxu0 %v3995_v22  ;;  %v3881_v17 = vpack.c.bf16 %v2360_v16, %v2359_v15  ;;  %v2436_v15 = vsub.s32 0, %v4152_v31 }
 0x3e2   :  { %v1658_v27 = vpop.f32.mrb[46].mxu1 }
 0x3e3   :  { %3560 = vmatmul.mubr.msk.f32.vlgmr.msra.gmra.mrb[22].mxu0 %vm627_vm2, %v1643_v8  ;;  %v3524_v28 = vpop.f32.mrb[47].mxu1  ;;  %v2943_v8 = vld [vmem:[%s4776_s4 + $0x218] sm:$0xff]  ;;  %v2437_v16 = vrot.slane %v4674_v44, %v2436_v15 }
 0x3e4   :  { %3837 = vmatpush3.bf16.msra.mxu0 %v3836_v20  ;;  %3570 = vmatprep.mubr.msk.f32.mxu0 %vm3996_vm3, %v3997_v23  ;;  %v3869_v10 = vpack.c.bf16 %v2943_v8, %v2942_v7  ;;  %v2596_v7 = vld [vmem:[%s4778_s6 + $0x68] sm:$0xff] }
 0x3e5   :  { %3838 = vmatprep.subr.bf16.mxu0 %v3995_v22 }
 0x3e6   :  { %v1663_v35 = vpop.f32.mrb[48].mxu1 }
 0x3e7   :  { %v3527_v38 = vpop.f32.mrb[49].mxu1  ;;  %3593 = vmatmul.mubr.msk.f32.vlgmr.msra.gmra.mrb[58].mxu1 %vm627_vm2, %v1663_v35 }
 0x3e8   :  { %3840 = vmatpush3.bf16.msra.mxu0 %v3839_v29  ;;  %3861 = vmatpush3.bf16.msra.mxu1 %v3860_v30 }
 0x3e9   :  { %3841 = vmatprep.subr.bf16.mxu0 %v3995_v22  ;;  %3862 = vmatprep.subr.bf16.mxu1 %v3995_v22 }
 0x3ea   :  { %v1668_v43 = vpop.f32.mrb[50].mxu1  ;;  %3614 = vmatprep.mubr.msk.f32.mxu1 %vm3996_vm3, %v3997_v23 }
 0x3eb   :  { %3571 = vmatmul.mubr.msk.f32.vlgmr.msra.gmra.mrb[24].mxu0 %vm627_vm2, %v1653_v18  ;;  %v3530_v46 = vpop.f32.mrb[51].mxu1 }
 0x3ec   :  { %3843 = vmatpush3.bf16.msra.mxu0 %v3842_v39  ;;  %3581 = vmatprep.mubr.msk.f32.mxu0 %vm3996_vm3, %v3997_v23 }
 0x3ed   :  { %3844 = vmatprep.subr.bf16.mxu0 %v3995_v22  ;;  %3864 = vmatpush3.bf16.msra.mxu1 %v3863_v42 }
 0x3ee   :  { %v1673_v51 = vpop.f32.mrb[52].mxu1  ;;  %3871 = vmatprep.subr.bf16.mxu1 %v3995_v22 }
 0x3ef   :  { %v3533_v53 = vpop.f32.mrb[53].mxu1 }
 0x3f0   :  { %3846 = vmatpush3.bf16.msra.mxu0 %v3845_v47  ;;  %3615 = vmatmul.mubr.msk.f32.vlgmr.msra.gmra.mrb[60].mxu1 %vm627_vm2, %v1673_v51  ;;  %v2353_v47 = vsub.s32 5, %v4152_v31 }
 0x3f1   :  { %3853 = vmatprep.subr.bf16.mxu0 %v3995_v22  ;;  %3873 = vmatpush3.bf16.msra.mxu1 %v3872_v50 }
 0x3f2   :  { %v1678_v58 = vpop.f32.mrb[54].mxu1  ;;  %3874 = vmatprep.subr.bf16.mxu1 %v3995_v22  ;;  %3636 = vmatprep.mubr.msk.f32.mxu1 %vm3996_vm3, %v3997_v23  ;;  %v2354_v53 = vrot.slane %v4674_v44, %v2353_v47 }
 0x3f3   :  { %3582 = vmatmul.mubr.msk.f32.vlgmr.msra.gmra.mrb[26].mxu0 %vm627_vm2, %v1658_v27  ;;  %v3536_v61 = vpop.f32.mrb[55].mxu1 }
 0x3f4   :  { %3855 = vmatpush3.bf16.msra.mxu0 %v3854_v54  ;;  %3603 = vmatprep.mubr.msk.f32.mxu0 %vm3996_vm3, %v3997_v23  ;;  %v2442_v61 = vld [vmem:[%s4778_s6 + $0x38] sm:$0xff] }
 0x3f5   :  { %3856 = vmatprep.subr.bf16.mxu0 %v3995_v22  ;;  %3876 = vmatpush3.bf16.msra.mxu1 %v3875_v57 }
 0x3f6   :  { %v1683_v2 = vpop.f32.mrb[56].mxu1  ;;  %3901 = vmatprep.subr.bf16.mxu1 %v3995_v22 }
 0x3f7   :  { %v3539_v5 = vpop.f32.mrb[57].mxu1 }
 0x3f8   :  { %3858 = vmatpush3.bf16.msra.mxu0 %v3857_v62  ;;  %3637 = vmatmul.mubr.msk.f32.vlgmr.msra.gmra.mrb[62].mxu1 %vm627_vm2, %v1683_v2  ;;  %v3887_v62 = vpack.c.bf16 %v2442_v61, %v2441_v60  ;;  %v3893_v5 = vpack.c.bf16 %v2520_v4, %v2519_v3 }
 0x3f9   :  { %3865 = vmatprep.subr.bf16.mxu0 %v3995_v22  ;;  %3903 = vmatpush3.bf16.msra.mxu1 %v3902_v1  ;;  %v3890_v1 = vpack.c.bf16 %v2518_v0, %v2517_v63 }
 0x3fa   :  { %3904 = vmatprep.subr.bf16.mxu1 %v3995_v22  ;;  %3691 = vmatprep.mubr.msk.f32.mxu1 %vm3996_vm3, %v3997_v23 }
 0x3fb   :  { %3604 = vmatmul.mubr.msk.f32.vlgmr.msra.gmra.mrb[28].mxu0 %vm627_vm2, %v1668_v43 }
 0x3fc   :  { %3867 = vmatpush3.bf16.msra.mxu0 %v3866_v6  ;;  %3625 = vmatprep.mubr.msk.f32.mxu0 %vm3996_vm3, %v3997_v23  ;;  %v2595_v6 = vld [vmem:[%s4778_s6 + $0x60] sm:$0xff] }
 0x3fd   :  { %3868 = vmatprep.subr.bf16.mxu0 %v3995_v22  ;;  %3906 = vmatpush3.bf16.msra.mxu1 %v3905_v9  ;;  %v3896_v8 = vpack.c.bf16 %v2596_v7, %v2595_v6 }
 0x3fe   :  { %3907 = vmatprep.subr.bf16.mxu1 %v3995_v22 }
 0x400   :  { %3870 = vmatpush3.bf16.msra.mxu0 %v3869_v10  ;;  %3692 = vmatmul.mubr.msk.f32.vlgmr.msra.gmra.mrb[64].mxu1 %vm627_vm2, %v4645_v11  ;;  %v2597_v10 = vld [vmem:[%s4778_s6 + $0x70] sm:$0xff] }
 0x401   :  { %3877 = vmatprep.subr.bf16.mxu0 %v3995_v22  ;;  %3702 = vmatprep.mubr.msk.f32.mxu1 %vm3996_vm3, %v3997_v23  ;;  %v3899_v13 = vpack.c.bf16 %v2598_v12, %v2597_v10 }
 0x403   :  { %3626 = vmatmul.mubr.msk.f32.vlgmr.msra.gmra.mrb[30].mxu0 %vm627_vm2, %v1678_v58  ;;  %v3884_v58 = vpack.c.bf16 %v2440_v56, %v2439_v55 }
 0x404   :  { %3647 = vmatprep.mubr.msk.f32.mxu0 %vm3996_vm3, %v3997_v23  ;;  %3879 = vmatpush3.bf16.msra.mxu0 %v3878_v14 }
 0x405   :  { %3880 = vmatprep.subr.bf16.mxu0 %v3995_v22 }
 0x408   :  { %3882 = vmatpush3.bf16.msra.mxu0 %v3881_v17 }
 0x409   :  { %3883 = vmatprep.subr.bf16.mxu0 %v3995_v22 }
 0x4ae   :  { %v1756_v18 = vpop.f32.mrb[20].mxu0 }
 0x4af   :  { %v3550_v19 = vpop.f32.mrb[21].mxu0 }
 0x4b6   :  { %v1829_v20 = vpop.f32.mrb[22].mxu0 }
 0x4b7   :  { %v1830_v21 = vadd.f32 %v1829_v20, %v1756_v18  ;;  %v3561_v24 = vpop.f32.mrb[23].mxu0 }
 0x4ba   :  { %v2050_v25 = vpop.f32.mrb[58].mxu1 }
 0x4bb   :  { %v3594_v26 = vpop.f32.mrb[59].mxu1 }
 0x4be   :  { %v1902_v27 = vpop.f32.mrb[24].mxu0 }
 0x4bf   :  { %v1906_v28 = vadd.f32 %v1902_v27, %v1830_v21  ;;  %v3572_v29 = vpop.f32.mrb[25].mxu0 }
 0x4c3   :  { %v2198_v30 = vpop.f32.mrb[60].mxu1 }
 0x4c4   :  { %v3616_v32 = vpop.f32.mrb[61].mxu1 }
 0x4c5   :  { %v2791_v32 = vld [vmem:[%s4778_s6 + $0xa8] sm:$0xff] }
 0x4c6   :  { %v1976_v34 = vpop.f32.mrb[26].mxu0 }
 0x4c7   :  { %v1980_v35 = vadd.f32 %v1976_v34, %v1906_v28  ;;  %v3583_v36 = vpop.f32.mrb[27].mxu0  ;;  %v2792_v34 = vld [vmem:[%s4778_s6 + $0xb0] sm:$0xff] }
 0x4c8   :  { %v2793_v36 = vld [vmem:[%s4778_s6 + $0xb8] sm:$0xff] }
 0x4c9   :  { %v2054_v37 = vadd.f32 %v2050_v25, %v1980_v35 }
 0x4cb   :  { %v2346_v38 = vpop.f32.mrb[62].mxu1 }
 0x4cc   :  { %v3638_v39 = vpop.f32.mrb[63].mxu1 }
 0x4ce   :  { %v2124_v41 = vpop.f32.mrb[28].mxu0 }
 0x4cf   :  { %v2128_v42 = vadd.f32 %v2124_v41, %v2054_v37  ;;  %v3605_v43 = vpop.f32.mrb[29].mxu0  ;;  %v3911_v37 = vpack.c.bf16 %v2793_v36, %v2792_v34 }
 0x4d1   :  { %v2202_v46 = vadd.f32 %v2198_v30, %v2128_v42  ;;  %v2790_v30 = vld [vmem:[%s4778_s6 + $0xa0] sm:$0xff] }
 0x4d2   :  { %v3908_v35 = vpack.c.bf16 %v2791_v32, %v2790_v30 }
 0x4d3   :  { %v2751_v48 = vpop.f32.mrb[64].mxu1 }
 0x4d4   :  { %v2752_v49 = vadd.f32 %v2751_v48, %v2681_v45  ;;  %v3693_v50 = vpop.f32.mrb[65].mxu1  ;;  %3909 = vmatpush3.bf16.msra.mxu1 %v3908_v35 }
 0x4d5   :  { %3910 = vmatprep.subr.bf16.mxu1 %v3995_v22 }
 0x4d6   :  { %v2272_v51 = vpop.f32.mrb[30].mxu0  ;;  %2763 = vrot.lane.b32.xlu0 %v2752_v49, %s3998_s14 }
 0x4d7   :  { %v2276_v33 = vadd.f32 %v2272_v51, %v2202_v46  ;;  %v3627_v52 = vpop.f32.mrb[31].mxu0 }
 0x4d8   :  { %3912 = vmatpush3.bf16.msra.mxu1 %v3911_v37 }
 0x4d9   :  { %v2350_v54 = vadd.f32 %v2346_v38, %v2276_v33 }
 0x4db   :  { %v2355_v57 = vadd.f32 %v2354_v53, %v2350_v54 }
 0x4dd   :  { %v2356_v59 = vmax.f32 %v2355_v57, 0.0 }
 0x4df   :  { %3648 = vmatmul.mubr.msk.f32.vlgmr.msra.gmra.mrb[32].mxu0 %vm627_vm2, %v2356_v59  ;;  %v2443_v2 = vrot.slane %v2356_v59, 2  ;;  %v2521_v9 = vrot.slane %v2356_v59, 4  ;;  %v2599_v14 = vrot.slane %v2356_v59, 6 }
 0x4e0   :  { %3885 = vmatpush3.bf16.msra.mxu0 %v3884_v58  ;;  %3658 = vmatprep.mubr.msk.f32.mxu0 %vm3996_vm3, %v3997_v23 }
 0x4e1   :  { %3886 = vmatprep.subr.bf16.mxu0 %v3995_v22 }
 0x4e4   :  { %3888 = vmatpush3.bf16.msra.mxu0 %v3887_v62 }
 0x4e5   :  { %3889 = vmatprep.subr.bf16.mxu0 %v3995_v22 }
 0x4e7   :  { %3659 = vmatmul.mubr.msk.f32.vlgmr.msra.gmra.mrb[32].mxu0 %vm627_vm2, %v2443_v2 }
 0x4e8   :  { %3891 = vmatpush3.bf16.msra.mxu0 %v3890_v1  ;;  %3669 = vmatprep.mubr.msk.f32.mxu0 %vm3996_vm3, %v3997_v23 }
 0x4e9   :  { %3892 = vmatprep.subr.bf16.mxu0 %v3995_v22 }
 0x4ec   :  { %3894 = vmatpush3.bf16.msra.mxu0 %v3893_v5 }
 0x4ed   :  { %3895 = vmatprep.subr.bf16.mxu0 %v3995_v22 }
 0x4ef   :  { %3670 = vmatmul.mubr.msk.f32.vlgmr.msra.gmra.mrb[32].mxu0 %vm627_vm2, %v2521_v9 }
 0x4f0   :  { %3897 = vmatpush3.bf16.msra.mxu0 %v3896_v8  ;;  %3680 = vmatprep.mubr.msk.f32.mxu0 %vm3996_vm3, %v3997_v23 }
 0x4f1   :  { %3898 = vmatprep.subr.bf16.mxu0 %v3995_v22  ;;  %v2796_v22 = vsub.s32 2, %v4152_v31 }
 0x4f3   :  { %v2797_v47 = vrot.slane %v4674_v44, %v2796_v22 }
 0x4f4   :  { %3900 = vmatpush3.bf16.msra.mxu0 %v3899_v13 }
 0x4f7   :  { %3681 = vmatmul.mubr.msk.f32.vlgmr.msra.gmra.mrb[32].mxu0 %vm627_vm2, %v2599_v14 }
 0x548   :  { %v2764_v23 = vpop.permute.xlu0 %2763 }
 0x5ca   :  { %v2668_v17 = vpop.f32.mrb[32].mxu0 }
 0x5cb   :  { %v3917_v18 = vadd.f32 %v2668_v17, %v2437_v16  ;;  %v3682_v19 = vpop.f32.mrb[33].mxu0 }
 0x5cd   :  { %v2755_v20 = vadd.f32 %v3917_v18, %v2752_v49 }
 0x5cf   :  { %v3024_v21 = vmul.f32 -1.442695, %v2755_v20 }
 0x5d1   :  { %3960 = vpow2.f32 %v3024_v21 }
 0x5db   :  { %v3961_v24 = vpop.eup %3960 }
 0x5dc   :  { %v2759_v25 = vadd.f32 1.0, %v3961_v24 }
 0x5de   :  { %3962 = vrcp.f32 %v2759_v25 }
 0x5e8   :  { %v3963_v26 = vpop.eup %3962 }
 0x5e9   :  { %v2766_v27 = vmul.f32 %v3963_v26, %v2764_v23  ;;  %v2773_v40 = vsub.f32 1.0, %v3963_v26 }
 0x5eb   :  { %2768 = vrot.lane.b32.xlu0 %v2766_v27, %s3998_s14  ;;  %s3999_s14 = smov 96  }
 0x65d   :  { %v2769_v28 = vpop.permute.xlu0 %2768 }
 0x65e   :  { %v2771_v29 = vadd.f32 %v3917_v18, %v2769_v28 }
 0x660   :  { %3964 = vtanh.f32 %v2771_v29 }
 0x66a   :  { %v3965_v38 = vpop.eup %3964 }
 0x66b   :  { %2775 = vrot.lane.b32.xlu1 %v3965_v38, %s3999_s14 }
 0x66f   :  { %2779 = vrot.lane.b32.xlu1 %v4645_v11, %s4000_s19 }
 0x6dd   :  { %v2776_v39 = vpop.permute.xlu1 %2775 }
 0x6de   :  { %v2778_v42 = vmul.f32 %v2776_v39, %v2773_v40 }
 0x6e1   :  { %v2780_v41 = vpop.permute.xlu1 %2779 }
 0x6e2   :  { %v2782_v43 = vmul.f32 %v3963_v26, %v2780_v41 }
 0x6e4   :  { %v2783_v45 = vadd.f32 %v2782_v43, %v2778_v42 }
 0x6e6   :  { %2785 = vrot.lane.b32.xlu0 %v2783_v45, %s3999_s14 }
 0x758   :  { %v2786_v46 = vpop.permute.xlu0 %2785 }
 0x759   :  { %2789 = vst.msk [vmem:[%s4782_s10] sm:$0x3] %vm2788_vm4, %v2786_v46  ;;  %3703 = vmatmul.mubr.msk.f32.vlgmr.msra.gmra.mrb[66].mxu1 %vm627_vm2, %v2786_v46  ;;  %s4001_s10 = smov 122  }
 0x82c   :  { %v2866_v11 = vpop.f32.mrb[66].mxu1 }
 0x82d   :  { %v2867_v48 = vadd.f32 %v2866_v11, %v2797_v47  ;;  %v3704_v49 = vpop.f32.mrb[67].mxu1 }
 0x82f   :  { %v2871_v50 = vsel %vm2870_vm5, %v2867_v48, -inf }
 0x830   :  { %2872 = vmax.xlane.f32.xlu1 %v2871_v50 }
 0x8bd   :  { %v2873_v51 = vpop.xlane.xlu1 %2872 }
 0x8be   :  { %v2874_v33 = vsub.f32 %v2867_v48, %v2873_v51 }
 0x8c0   :  { %v2875_v52 = vmul.f32 1.442695, %v2874_v33 }
 0x8c2   :  { %3966 = vpow2.f32 %v2875_v52 }
 0x8cc   :  { %v3967_v53 = vpop.eup %3966 }
 0x8cd   :  { %v2877_v54 = vsel %vm2870_vm5, %v3967_v53, 0.0 }
 0x8ce   :  { %2878 = vadd.xlane.f32.xlu0 %v2877_v54 }
 0x8e4   :  { %2885 = vrot.lane.b32.xlu0 %v2867_v48, %s4001_s10 }
 0x95b   :  { %v2879_v31 = vpop.xlane.xlu0 %2878 }
 0x95c   :  { %3968 = vlog2.f32 %v2879_v31 }
 0x95f   :  { %v2886_v44 = vpop.permute.xlu0 %2885 }
 0x960   :  { %2889 = vst.msk [vmem:[%s4780_s8] sm:$0x3] %vm2888_vm6, %v2886_v44 }
 0x966   :  { %v3969_v55 = vpop.eup %3968 }
 0x967   :  { %v2881_v56 = vmul.f32 0.6931472, %v3969_v55 }
 0x969   :  { %v2882_v57 = vsub.f32 %v2874_v33, %v2881_v56 }
 0x96b   :  { %2883 = vst.msk [vmem:[#allocation2] sm:$0x3] %vm2870_vm5, %v2882_v57 }
 0x96c   :  { %3982 = shalt.err (!%p3979_p4)
}
 0x96d   :  { %s3983_s27 = scalar_lea.hbm %s4781_s9, 32 }
 0x96e   :  { %p3984_p5 = scmp.ne.s32.totalorder %s4781_s9, %s3983_s27  ;;  %p3987_p6 = scmp.lt.u32.totalorder %s3983_s27, %s4781_s9 }
 0x970   :  { %p3989_p7 = pnand %p3987_p6, %p3984_p5 }
 0x972   :  { %3992 = shalt.err (!%p3989_p7)
}
 0x973   :  { %2901 = dma.vmem_to_hbm [thread:$0]  %s2899_s23, 32, %s4781_s9, [#allocation3]  }
 0x974   :  { %3993 = dma.done.wait [#allocation3], 32  }
 0x975   :  { %3994 = vsyncadd [#allocation3], 4294967264 }
 0x976   :  { %2911 = vsyncpa [#allocation3], 1 }

</bundles_post_ra>
